<compile_context>
chip_gen: v7x
topology: tpu7x:2x2x1
jax: 0.10.0
libtpu: 0.0.40
codegen_flags: <defaults>
</compile_context>

<pallas_src>
import functools

import jax
import jax.numpy as jnp
from jax.experimental import pallas as pl
from jax.experimental.pallas import tpu as pltpu


# -----------------------------------------------------------------------------
# Fused kernel
# -----------------------------------------------------------------------------
def _xvector_fused_kernel(*refs, conv_kd, t_valid, mxu_dtype):
    """Whole X_vector forward for one (small) batch.

    refs = (x2d, sel,
            [w_flat, bias, bn_scale, bn_shift] * 5 conv layers,
            w1, b1, sc1, sh1, w2, b2, sc2, sh2, w3, b3,
            out)

    x2d:    (C_in, B*T0)         batch packed along lanes, stride T0 per sample
    sel:    (width_last, B)      0/1 segment-selection matrix for stats pooling
    w_flat: (C_out, K*C_in)      im2col-flattened conv weights
    bias/bn_scale/bn_shift:      (C_out, 1) per-channel columns
    fc w*:  (out, in)            (PyTorch Linear layout -> column-major matmuls)
    fc b*/sc*/sh*:               (out, 1)
    out:    (num_classes, B)     column-major probabilities
    """
    x_ref = refs[0]
    sel_ref = refs[1]
    o_ref = refs[-1]
    p = refs[2:-1]

    x = x_ref[...]                       # (C_in, B*T0), f32
    width = x.shape[1]

    # ---- TDNN stack: one im2col matmul per layer ---------------------------
    pi = 0
    for (k_taps, dil) in conv_kd:
        w_flat = p[pi][...]
        bias = p[pi + 1][...]
        scale = p[pi + 2][...]
        shift = p[pi + 3][...]
        pi += 4

        new_width = width - dil * (k_taps - 1)
        if k_taps == 1:
            patch = x
        else:
            # Static lane-shifted slices; sublane concat (C_in multiple of 8).
            taps = [x[:, k * dil: k * dil + new_width] for k in range(k_taps)]
            patch = jnp.concatenate(taps, axis=0)        # (K*C_in, new_width)

        y = jnp.dot(w_flat.astype(mxu_dtype), patch.astype(mxu_dtype),
                    preferred_element_type=jnp.float32)  # (C_out, new_width)
        y = jnp.maximum(y + bias, 0.0)                   # conv bias + ReLU
        x = y * scale + shift                            # folded BN (eval)
        width = new_width

    # ---- stats pooling: mean / unbiased std via segment-selection matmul ---
    sel = sel_ref[...]                                   # (width_last, B) 0/1
    assert x.shape[1] == sel.shape[0], "conv width / sel mismatch"

    inv_n = 1.0 / t_valid
    inv_nm1 = 1.0 / (t_valid - 1)
    # Keep stats matmuls in f32 regardless of mxu_dtype (they are tiny and
    # numerically sensitive).
    sums = jnp.dot(x, sel, preferred_element_type=jnp.float32)       # (C, B)
    sumsq = jnp.dot(x * x, sel, preferred_element_type=jnp.float32)  # (C, B)
    mean_mat = sums * inv_n
    var = jnp.maximum((sumsq - mean_mat * sums) * inv_nm1, 0.0)
    std_mat = jnp.sqrt(var)
    s_t = jnp.concatenate([mean_mat, std_mat], axis=0)   # (4H, B) column-major

    # ---- FC head (column-major: features on sublanes, batch on lanes) ------
    w1, b1, sc1, sh1, w2, b2, sc2, sh2, w3, b3 = p[pi:]

    h = jnp.dot(w1[...].astype(mxu_dtype), s_t.astype(mxu_dtype),
                preferred_element_type=jnp.float32) + b1[...]
    h = jnp.maximum(h, 0.0) * sc1[...] + sh1[...]

    h = jnp.dot(w2[...].astype(mxu_dtype), h.astype(mxu_dtype),
                preferred_element_type=jnp.float32) + b2[...]
    h = jnp.maximum(h, 0.0) * sc2[...] + sh2[...]

    logits = jnp.dot(w3[...].astype(mxu_dtype), h.astype(mxu_dtype),
                     preferred_element_type=jnp.float32) + b3[...]

    mx = jnp.max(logits, axis=0, keepdims=True)          # (1, B)
    e = jnp.exp(logits - mx)
    denom = jnp.sum(e, axis=0, keepdims=True)            # (1, B)
    probs = e * pl.reciprocal(denom, approx=True)        # EUP reciprocal
    o_ref[...] = probs.astype(o_ref.dtype)


# -----------------------------------------------------------------------------
# Wrapper
# -----------------------------------------------------------------------------
def x_vector_forward(x, params, num_classes, *, mxu_dtype=jnp.float32):
    """x: (B, 1, C_in, T) -> (B, num_classes) softmax probabilities.

    mxu_dtype=jnp.bfloat16 halves MXU cost on v6e/v7x (f32 accumulation is
    kept); default f32 preserves the reference module's numerics.
    """
    x = jnp.squeeze(x, axis=1)                           # (B, C_in, T)
    B, C_in, T0 = x.shape
    # Pack batch along the lane/time axis: (C_in, B*T0), stride T0 per sample.
    x2d = jnp.transpose(x, (1, 0, 2)).reshape(C_in, B * T0)

    conv_kd = tuple((k, dil) for (_, _, _, _, k, dil) in params["conv"])
    shrink = sum(dil * (k - 1) for (k, dil) in conv_kd)
    t_valid = T0 - shrink
    assert t_valid >= 2, "sequence too short for unbiased std"
    width_last = (B - 1) * T0 + t_valid

    # Segment-selection matrix for stats pooling: sel[b*T0 + t, b] = 1 iff
    # t < t_valid.  Computed once at trace time; excludes invalid tail lanes.
    lane = jnp.arange(width_last)[:, None]               # (width_last, 1)
    start = (jnp.arange(B) * T0)[None, :]                # (1, B)
    sel = ((lane >= start) & (lane < start + t_valid)).astype(jnp.float32)

    flat_inputs = [x2d, sel]
    for (w_flat, b, sc, sh, k, dil) in params["conv"]:
        flat_inputs += [w_flat, b, sc, sh]
    flat_inputs += list(params["fc"])

    kernel = functools.partial(
        _xvector_fused_kernel,
        conv_kd=conv_kd, t_valid=t_valid, mxu_dtype=mxu_dtype)

    out_t = pl.pallas_call(
        kernel,
        out_shape=jax.ShapeDtypeStruct((num_classes, B), jnp.float32),
        compiler_params=pltpu.CompilerParams(
            vmem_limit_bytes=64 * 1024 * 1024),
    )(*flat_inputs)
    return out_t.T                                       # (B, num_classes)


# -----------------------------------------------------------------------------
# Parameter construction (deterministic, synthetic, PyTorch layouts)
# -----------------------------------------------------------------------------
def _fold_bn(gamma, beta, mean, var, eps=1e-5):
    scale = gamma / jnp.sqrt(var + eps)
    shift = beta - mean * scale
    return scale, shift


def make_params(key, input_dim, hidden, num_classes):
    conv_cfg = [
        # (C_in, C_out, K, dilation)
        (input_dim, hidden, 5, 1),
        (hidden, hidden, 5, 2),
        (hidden, hidden, 7, 3),
        (hidden, 2 * hidden, 2, 1),
        (2 * hidden, 2 * hidden, 1, 1),
    ]
    keys = iter(jax.random.split(key, 48))

    conv_params = []
    for (cin, cout, k, dil) in conv_cfg:
        # PyTorch Conv1d layout (C_out, C_in, K) -> im2col (C_out, K*C_in)
        w = 0.1 * jax.random.normal(next(keys), (cout, cin, k), jnp.float32)
        w_flat = jnp.transpose(w, (0, 2, 1)).reshape(cout, k * cin)
        b = 0.1 * jax.random.normal(next(keys), (cout, 1), jnp.float32)
        gamma = 1.0 + 0.1 * jax.random.normal(next(keys), (cout, 1), jnp.float32)
        beta = 0.1 * jax.random.normal(next(keys), (cout, 1), jnp.float32)
        rmean = 0.1 * jax.random.normal(next(keys), (cout, 1), jnp.float32)
        rvar = jnp.abs(1.0 + 0.1 * jax.random.normal(next(keys), (cout, 1),
                                                     jnp.float32))
        scale, shift = _fold_bn(gamma, beta, rmean, rvar)
        conv_params.append((w_flat, b, scale, shift, k, dil))

    def _fc(kin, kout, with_bn):
        w = 0.1 * jax.random.normal(next(keys), (kout, kin), jnp.float32)
        b = 0.1 * jax.random.normal(next(keys), (kout, 1), jnp.float32)
        if not with_bn:
            return w, b
        gamma = 1.0 + 0.1 * jax.random.normal(next(keys), (kout, 1), jnp.float32)
        beta = 0.1 * jax.random.normal(next(keys), (kout, 1), jnp.float32)
        rmean = 0.1 * jax.random.normal(next(keys), (kout, 1), jnp.float32)
        rvar = jnp.abs(1.0 + 0.1 * jax.random.normal(next(keys), (kout, 1),
                                                     jnp.float32))
        scale, shift = _fold_bn(gamma, beta, rmean, rvar)
        return w, b, scale, shift

    w1, b1, sc1, sh1 = _fc(4 * hidden, hidden, True)
    w2, b2, sc2, sh2 = _fc(hidden, hidden // 4, True)
    w3, b3 = _fc(hidden // 4, num_classes, False)
    return {"conv": conv_params,
            "fc": (w1, b1, sc1, sh1, w2, b2, sc2, sh2, w3, b3)}


# -----------------------------------------------------------------------------
# Pure-JAX reference (for correctness check only)
# -----------------------------------------------------------------------------
def _reference_forward(x, params):
    x = jnp.squeeze(x, axis=1)                           # (B, C_in, T)
    for (w_flat, b, scale, shift, k, dil) in params["conv"]:
        B, cin, t_in = x.shape
        cout = w_flat.shape[0]
        t_out = t_in - dil * (k - 1)
        w = w_flat.reshape(cout, k, cin)                 # (C_out, K, C_in)
        y = jnp.zeros((B, cout, t_out), jnp.float32)
        for kk in range(k):
            xk = x[:, :, kk * dil: kk * dil + t_out]
            y = y + jnp.einsum('oc,bct->bot', w[:, kk, :], xk)
        y = jnp.maximum(y + b[None, :, :], 0.0)
        x = y * scale[None, :, :] + shift[None, :, :]
    mean = jnp.mean(x, axis=2)                           # (B, C)
    std = jnp.sqrt(jnp.var(x, axis=2, ddof=1))           # torch.std: unbiased
    stats = jnp.concatenate([mean, std], axis=1)         # (B, 2C)

    w1, b1, sc1, sh1, w2, b2, sc2, sh2, w3, b3 = params["fc"]
    h = stats @ w1.T + b1[:, 0]
    h = jnp.maximum(h, 0.0) * sc1[:, 0] + sh1[:, 0]
    h = h @ w2.T + b2[:, 0]
    h = jnp.maximum(h, 0.0) * sc2[:, 0] + sh2[:, 0]
    logits = h @ w3.T + b3[:, 0]
    return jax.nn.softmax(logits, axis=1)


# -----------------------------------------------------------------------------
if __name__ == "__main__":
    B = 2
    N_MFCC = 8        # input_dim
    HIDDEN = 16       # hidden_size (divisible by 4)
    N_CLASS = 8       # num_classes
    T = 40            # > 31 so every dilated conv has positive output length

    key = jax.random.PRNGKey(0)
    k_in, k_par = jax.random.split(key)
    x = jax.random.normal(k_in, (B, 1, N_MFCC, T), jnp.float32)
    params = make_params(k_par, N_MFCC, HIDDEN, N_CLASS)

    out = x_vector_forward(x, params, N_CLASS)
    out = jax.block_until_ready(out)

    assert out.shape == (B, N_CLASS)
    assert bool(jnp.all(jnp.isfinite(out)))
    # softmax rows sum to 1 (approx reciprocal -> loose tolerance)
    assert bool(jnp.allclose(jnp.sum(out, axis=1), 1.0, atol=1e-2))

    ref = _reference_forward(x, params)
    max_err = float(jnp.max(jnp.abs(out - ref)))
    assert bool(jnp.allclose(out, ref, atol=1e-2, rtol=1e-2)), (
        f"mismatch vs reference, max abs err = {max_err}")

    print("KERNEL_OK")
</pallas_src>

<mosaic_0001>
module attributes {stable_mosaic.version = 11 : i64} {
  func.func @_xvector_fused_kernel(%arg0: memref<8x80xf32, #tpu.memory_space<vmem>>, %arg1: memref<49x2xf32, #tpu.memory_space<vmem>>, %arg2: memref<16x40xf32, #tpu.memory_space<vmem>>, %arg3: memref<16x1xf32, #tpu.memory_space<vmem>>, %arg4: memref<16x1xf32, #tpu.memory_space<vmem>>, %arg5: memref<16x1xf32, #tpu.memory_space<vmem>>, %arg6: memref<16x80xf32, #tpu.memory_space<vmem>>, %arg7: memref<16x1xf32, #tpu.memory_space<vmem>>, %arg8: memref<16x1xf32, #tpu.memory_space<vmem>>, %arg9: memref<16x1xf32, #tpu.memory_space<vmem>>, %arg10: memref<16x112xf32, #tpu.memory_space<vmem>>, %arg11: memref<16x1xf32, #tpu.memory_space<vmem>>, %arg12: memref<16x1xf32, #tpu.memory_space<vmem>>, %arg13: memref<16x1xf32, #tpu.memory_space<vmem>>, %arg14: memref<32x32xf32, #tpu.memory_space<vmem>>, %arg15: memref<32x1xf32, #tpu.memory_space<vmem>>, %arg16: memref<32x1xf32, #tpu.memory_space<vmem>>, %arg17: memref<32x1xf32, #tpu.memory_space<vmem>>, %arg18: memref<32x32xf32, #tpu.memory_space<vmem>>, %arg19: memref<32x1xf32, #tpu.memory_space<vmem>>, %arg20: memref<32x1xf32, #tpu.memory_space<vmem>>, %arg21: memref<32x1xf32, #tpu.memory_space<vmem>>, %arg22: memref<16x64xf32, #tpu.memory_space<vmem>>, %arg23: memref<16x1xf32, #tpu.memory_space<vmem>>, %arg24: memref<16x1xf32, #tpu.memory_space<vmem>>, %arg25: memref<16x1xf32, #tpu.memory_space<vmem>>, %arg26: memref<4x16xf32, #tpu.memory_space<vmem>>, %arg27: memref<4x1xf32, #tpu.memory_space<vmem>>, %arg28: memref<4x1xf32, #tpu.memory_space<vmem>>, %arg29: memref<4x1xf32, #tpu.memory_space<vmem>>, %arg30: memref<8x4xf32, #tpu.memory_space<vmem>>, %arg31: memref<8x1xf32, #tpu.memory_space<vmem>>, %arg32: memref<8x2xf32, #tpu.memory_space<vmem>>) attributes {dimension_semantics = [], scalar_prefetch = 0 : i64, scratch_operands = 0 : i64, tpu.core_type = #tpu.core_type<tc>} {
    %c0 = arith.constant 0 : index
    %c0_0 = arith.constant 0 : index
    %0 = vector.load %arg0[%c0, %c0_0] : memref<8x80xf32, #tpu.memory_space<vmem>>, vector<8x80xf32>
    %c0_1 = arith.constant 0 : index
    %c0_2 = arith.constant 0 : index
    %1 = vector.load %arg2[%c0_1, %c0_2] : memref<16x40xf32, #tpu.memory_space<vmem>>, vector<16x40xf32>
    %c0_3 = arith.constant 0 : index
    %c0_4 = arith.constant 0 : index
    %2 = vector.load %arg3[%c0_3, %c0_4] : memref<16x1xf32, #tpu.memory_space<vmem>>, vector<16x1xf32>
    %c0_5 = arith.constant 0 : index
    %c0_6 = arith.constant 0 : index
    %3 = vector.load %arg4[%c0_5, %c0_6] : memref<16x1xf32, #tpu.memory_space<vmem>>, vector<16x1xf32>
    %c0_7 = arith.constant 0 : index
    %c0_8 = arith.constant 0 : index
    %4 = vector.load %arg5[%c0_7, %c0_8] : memref<16x1xf32, #tpu.memory_space<vmem>>, vector<16x1xf32>
    %5 = vector.extract_strided_slice %0 {offsets = [0, 0], sizes = [8, 76], strides = [1, 1]} : vector<8x80xf32> to vector<8x76xf32>
    %6 = vector.extract_strided_slice %0 {offsets = [0, 1], sizes = [8, 76], strides = [1, 1]} : vector<8x80xf32> to vector<8x76xf32>
    %7 = vector.extract_strided_slice %0 {offsets = [0, 2], sizes = [8, 76], strides = [1, 1]} : vector<8x80xf32> to vector<8x76xf32>
    %8 = vector.extract_strided_slice %0 {offsets = [0, 3], sizes = [8, 76], strides = [1, 1]} : vector<8x80xf32> to vector<8x76xf32>
    %9 = vector.extract_strided_slice %0 {offsets = [0, 4], sizes = [8, 76], strides = [1, 1]} : vector<8x80xf32> to vector<8x76xf32>
    %10 = tpu.concatenate %5, %6, %7, %8, %9 in 0 : vector<8x76xf32>, vector<8x76xf32>, vector<8x76xf32>, vector<8x76xf32>, vector<8x76xf32> -> vector<40x76xf32>
    %cst = arith.constant dense<0.000000e+00> : vector<16x76xf32>
    %11 = tpu.matmul %1, %10, %cst {dimension_numbers = #tpu.dot_dimension_numbers<[1], [0], [0], [1], [0, 0, 1, 1], [], []>} : vector<16x40xf32>, vector<40x76xf32>, vector<16x76xf32> -> vector<16x76xf32>
    %12 = vector.broadcast %2 : vector<16x1xf32> to vector<16x76xf32>
    %13 = arith.addf %11, %12 : vector<16x76xf32>
    %cst_9 = arith.constant 0.000000e+00 : f32
    %14 = vector.broadcast %cst_9 : f32 to vector<16x76xf32>
    %15 = arith.maximumf %13, %14 : vector<16x76xf32>
    %16 = vector.broadcast %3 : vector<16x1xf32> to vector<16x76xf32>
    %17 = arith.mulf %15, %16 : vector<16x76xf32>
    %18 = vector.broadcast %4 : vector<16x1xf32> to vector<16x76xf32>
    %19 = arith.addf %17, %18 : vector<16x76xf32>
    %c0_10 = arith.constant 0 : index
    %c0_11 = arith.constant 0 : index
    %20 = vector.load %arg6[%c0_10, %c0_11] : memref<16x80xf32, #tpu.memory_space<vmem>>, vector<16x80xf32>
    %c0_12 = arith.constant 0 : index
    %c0_13 = arith.constant 0 : index
    %21 = vector.load %arg7[%c0_12, %c0_13] : memref<16x1xf32, #tpu.memory_space<vmem>>, vector<16x1xf32>
    %c0_14 = arith.constant 0 : index
    %c0_15 = arith.constant 0 : index
    %22 = vector.load %arg8[%c0_14, %c0_15] : memref<16x1xf32, #tpu.memory_space<vmem>>, vector<16x1xf32>
    %c0_16 = arith.constant 0 : index
    %c0_17 = arith.constant 0 : index
    %23 = vector.load %arg9[%c0_16, %c0_17] : memref<16x1xf32, #tpu.memory_space<vmem>>, vector<16x1xf32>
    %24 = vector.extract_strided_slice %19 {offsets = [0, 0], sizes = [16, 68], strides = [1, 1]} : vector<16x76xf32> to vector<16x68xf32>
    %25 = vector.extract_strided_slice %19 {offsets = [0, 2], sizes = [16, 68], strides = [1, 1]} : vector<16x76xf32> to vector<16x68xf32>
    %26 = vector.extract_strided_slice %19 {offsets = [0, 4], sizes = [16, 68], strides = [1, 1]} : vector<16x76xf32> to vector<16x68xf32>
    %27 = vector.extract_strided_slice %19 {offsets = [0, 6], sizes = [16, 68], strides = [1, 1]} : vector<16x76xf32> to vector<16x68xf32>
    %28 = vector.extract_strided_slice %19 {offsets = [0, 8], sizes = [16, 68], strides = [1, 1]} : vector<16x76xf32> to vector<16x68xf32>
    %29 = tpu.concatenate %24, %25, %26, %27, %28 in 0 : vector<16x68xf32>, vector<16x68xf32>, vector<16x68xf32>, vector<16x68xf32>, vector<16x68xf32> -> vector<80x68xf32>
    %cst_18 = arith.constant dense<0.000000e+00> : vector<16x68xf32>
    %30 = tpu.matmul %20, %29, %cst_18 {dimension_numbers = #tpu.dot_dimension_numbers<[1], [0], [0], [1], [0, 0, 1, 1], [], []>} : vector<16x80xf32>, vector<80x68xf32>, vector<16x68xf32> -> vector<16x68xf32>
    %31 = vector.broadcast %21 : vector<16x1xf32> to vector<16x68xf32>
    %32 = arith.addf %30, %31 : vector<16x68xf32>
    %cst_19 = arith.constant 0.000000e+00 : f32
    %33 = vector.broadcast %cst_19 : f32 to vector<16x68xf32>
    %34 = arith.maximumf %32, %33 : vector<16x68xf32>
    %35 = vector.broadcast %22 : vector<16x1xf32> to vector<16x68xf32>
    %36 = arith.mulf %34, %35 : vector<16x68xf32>
    %37 = vector.broadcast %23 : vector<16x1xf32> to vector<16x68xf32>
    %38 = arith.addf %36, %37 : vector<16x68xf32>
    %c0_20 = arith.constant 0 : index
    %c0_21 = arith.constant 0 : index
    %39 = vector.load %arg10[%c0_20, %c0_21] : memref<16x112xf32, #tpu.memory_space<vmem>>, vector<16x112xf32>
    %c0_22 = arith.constant 0 : index
    %c0_23 = arith.constant 0 : index
    %40 = vector.load %arg11[%c0_22, %c0_23] : memref<16x1xf32, #tpu.memory_space<vmem>>, vector<16x1xf32>
    %c0_24 = arith.constant 0 : index
    %c0_25 = arith.constant 0 : index
    %41 = vector.load %arg12[%c0_24, %c0_25] : memref<16x1xf32, #tpu.memory_space<vmem>>, vector<16x1xf32>
    %c0_26 = arith.constant 0 : index
    %c0_27 = arith.constant 0 : index
    %42 = vector.load %arg13[%c0_26, %c0_27] : memref<16x1xf32, #tpu.memory_space<vmem>>, vector<16x1xf32>
    %43 = vector.extract_strided_slice %38 {offsets = [0, 0], sizes = [16, 50], strides = [1, 1]} : vector<16x68xf32> to vector<16x50xf32>
    %44 = vector.extract_strided_slice %38 {offsets = [0, 3], sizes = [16, 50], strides = [1, 1]} : vector<16x68xf32> to vector<16x50xf32>
    %45 = vector.extract_strided_slice %38 {offsets = [0, 6], sizes = [16, 50], strides = [1, 1]} : vector<16x68xf32> to vector<16x50xf32>
    %46 = vector.extract_strided_slice %38 {offsets = [0, 9], sizes = [16, 50], strides = [1, 1]} : vector<16x68xf32> to vector<16x50xf32>
    %47 = vector.extract_strided_slice %38 {offsets = [0, 12], sizes = [16, 50], strides = [1, 1]} : vector<16x68xf32> to vector<16x50xf32>
    %48 = vector.extract_strided_slice %38 {offsets = [0, 15], sizes = [16, 50], strides = [1, 1]} : vector<16x68xf32> to vector<16x50xf32>
    %49 = vector.extract_strided_slice %38 {offsets = [0, 18], sizes = [16, 50], strides = [1, 1]} : vector<16x68xf32> to vector<16x50xf32>
    %50 = tpu.concatenate %43, %44, %45, %46, %47, %48, %49 in 0 : vector<16x50xf32>, vector<16x50xf32>, vector<16x50xf32>, vector<16x50xf32>, vector<16x50xf32>, vector<16x50xf32>, vector<16x50xf32> -> vector<112x50xf32>
    %cst_28 = arith.constant dense<0.000000e+00> : vector<16x50xf32>
    %51 = tpu.matmul %39, %50, %cst_28 {dimension_numbers = #tpu.dot_dimension_numbers<[1], [0], [0], [1], [0, 0, 1, 1], [], []>} : vector<16x112xf32>, vector<112x50xf32>, vector<16x50xf32> -> vector<16x50xf32>
    %52 = vector.broadcast %40 : vector<16x1xf32> to vector<16x50xf32>
    %53 = arith.addf %51, %52 : vector<16x50xf32>
    %cst_29 = arith.constant 0.000000e+00 : f32
    %54 = vector.broadcast %cst_29 : f32 to vector<16x50xf32>
    %55 = arith.maximumf %53, %54 : vector<16x50xf32>
    %56 = vector.broadcast %41 : vector<16x1xf32> to vector<16x50xf32>
    %57 = arith.mulf %55, %56 : vector<16x50xf32>
    %58 = vector.broadcast %42 : vector<16x1xf32> to vector<16x50xf32>
    %59 = arith.addf %57, %58 : vector<16x50xf32>
    %c0_30 = arith.constant 0 : index
    %c0_31 = arith.constant 0 : index
    %60 = vector.load %arg14[%c0_30, %c0_31] : memref<32x32xf32, #tpu.memory_space<vmem>>, vector<32x32xf32>
    %c0_32 = arith.constant 0 : index
    %c0_33 = arith.constant 0 : index
    %61 = vector.load %arg15[%c0_32, %c0_33] : memref<32x1xf32, #tpu.memory_space<vmem>>, vector<32x1xf32>
    %c0_34 = arith.constant 0 : index
    %c0_35 = arith.constant 0 : index
    %62 = vector.load %arg16[%c0_34, %c0_35] : memref<32x1xf32, #tpu.memory_space<vmem>>, vector<32x1xf32>
    %c0_36 = arith.constant 0 : index
    %c0_37 = arith.constant 0 : index
    %63 = vector.load %arg17[%c0_36, %c0_37] : memref<32x1xf32, #tpu.memory_space<vmem>>, vector<32x1xf32>
    %64 = vector.extract_strided_slice %59 {offsets = [0, 0], sizes = [16, 49], strides = [1, 1]} : vector<16x50xf32> to vector<16x49xf32>
    %65 = vector.extract_strided_slice %59 {offsets = [0, 1], sizes = [16, 49], strides = [1, 1]} : vector<16x50xf32> to vector<16x49xf32>
    %66 = tpu.concatenate %64, %65 in 0 : vector<16x49xf32>, vector<16x49xf32> -> vector<32x49xf32>
    %cst_38 = arith.constant dense<0.000000e+00> : vector<32x49xf32>
    %67 = tpu.matmul %60, %66, %cst_38 {dimension_numbers = #tpu.dot_dimension_numbers<[1], [0], [0], [1], [0, 0, 1, 1], [], []>} : vector<32x32xf32>, vector<32x49xf32>, vector<32x49xf32> -> vector<32x49xf32>
    %68 = vector.broadcast %61 : vector<32x1xf32> to vector<32x49xf32>
    %69 = arith.addf %67, %68 : vector<32x49xf32>
    %cst_39 = arith.constant 0.000000e+00 : f32
    %70 = vector.broadcast %cst_39 : f32 to vector<32x49xf32>
    %71 = arith.maximumf %69, %70 : vector<32x49xf32>
    %72 = vector.broadcast %62 : vector<32x1xf32> to vector<32x49xf32>
    %73 = arith.mulf %71, %72 : vector<32x49xf32>
    %74 = vector.broadcast %63 : vector<32x1xf32> to vector<32x49xf32>
    %75 = arith.addf %73, %74 : vector<32x49xf32>
    %c0_40 = arith.constant 0 : index
    %c0_41 = arith.constant 0 : index
    %76 = vector.load %arg18[%c0_40, %c0_41] : memref<32x32xf32, #tpu.memory_space<vmem>>, vector<32x32xf32>
    %c0_42 = arith.constant 0 : index
    %c0_43 = arith.constant 0 : index
    %77 = vector.load %arg19[%c0_42, %c0_43] : memref<32x1xf32, #tpu.memory_space<vmem>>, vector<32x1xf32>
    %c0_44 = arith.constant 0 : index
    %c0_45 = arith.constant 0 : index
    %78 = vector.load %arg20[%c0_44, %c0_45] : memref<32x1xf32, #tpu.memory_space<vmem>>, vector<32x1xf32>
    %c0_46 = arith.constant 0 : index
    %c0_47 = arith.constant 0 : index
    %79 = vector.load %arg21[%c0_46, %c0_47] : memref<32x1xf32, #tpu.memory_space<vmem>>, vector<32x1xf32>
    %cst_48 = arith.constant dense<0.000000e+00> : vector<32x49xf32>
    %80 = tpu.matmul %76, %75, %cst_48 {dimension_numbers = #tpu.dot_dimension_numbers<[1], [0], [0], [1], [0, 0, 1, 1], [], []>} : vector<32x32xf32>, vector<32x49xf32>, vector<32x49xf32> -> vector<32x49xf32>
    %81 = vector.broadcast %77 : vector<32x1xf32> to vector<32x49xf32>
    %82 = arith.addf %80, %81 : vector<32x49xf32>
    %cst_49 = arith.constant 0.000000e+00 : f32
    %83 = vector.broadcast %cst_49 : f32 to vector<32x49xf32>
    %84 = arith.maximumf %82, %83 : vector<32x49xf32>
    %85 = vector.broadcast %78 : vector<32x1xf32> to vector<32x49xf32>
    %86 = arith.mulf %84, %85 : vector<32x49xf32>
    %87 = vector.broadcast %79 : vector<32x1xf32> to vector<32x49xf32>
    %88 = arith.addf %86, %87 : vector<32x49xf32>
    %c0_50 = arith.constant 0 : index
    %c0_51 = arith.constant 0 : index
    %89 = vector.load %arg1[%c0_50, %c0_51] : memref<49x2xf32, #tpu.memory_space<vmem>>, vector<49x2xf32>
    %cst_52 = arith.constant dense<0.000000e+00> : vector<32x2xf32>
    %90 = tpu.matmul %88, %89, %cst_52 {dimension_numbers = #tpu.dot_dimension_numbers<[1], [0], [0], [1], [0, 0, 1, 1], [], []>} : vector<32x49xf32>, vector<49x2xf32>, vector<32x2xf32> -> vector<32x2xf32>
    %91 = arith.mulf %88, %88 : vector<32x49xf32>
    %cst_53 = arith.constant dense<0.000000e+00> : vector<32x2xf32>
    %92 = tpu.matmul %91, %89, %cst_53 {dimension_numbers = #tpu.dot_dimension_numbers<[1], [0], [0], [1], [0, 0, 1, 1], [], []>} : vector<32x49xf32>, vector<49x2xf32>, vector<32x2xf32> -> vector<32x2xf32>
    %cst_54 = arith.constant 0.111111112 : f32
    %93 = vector.broadcast %cst_54 : f32 to vector<32x2xf32>
    %94 = arith.mulf %90, %93 : vector<32x2xf32>
    %95 = arith.mulf %94, %90 : vector<32x2xf32>
    %96 = arith.subf %92, %95 : vector<32x2xf32>
    %cst_55 = arith.constant 1.250000e-01 : f32
    %97 = vector.broadcast %cst_55 : f32 to vector<32x2xf32>
    %98 = arith.mulf %96, %97 : vector<32x2xf32>
    %cst_56 = arith.constant 0.000000e+00 : f32
    %99 = vector.broadcast %cst_56 : f32 to vector<32x2xf32>
    %100 = arith.maximumf %98, %99 : vector<32x2xf32>
    %101 = math.sqrt %100 : vector<32x2xf32>
    %102 = tpu.concatenate %94, %101 in 0 : vector<32x2xf32>, vector<32x2xf32> -> vector<64x2xf32>
    %c0_57 = arith.constant 0 : index
    %c0_58 = arith.constant 0 : index
    %103 = vector.load %arg22[%c0_57, %c0_58] : memref<16x64xf32, #tpu.memory_space<vmem>>, vector<16x64xf32>
    %cst_59 = arith.constant dense<0.000000e+00> : vector<16x2xf32>
    %104 = tpu.matmul %103, %102, %cst_59 {dimension_numbers = #tpu.dot_dimension_numbers<[1], [0], [0], [1], [0, 0, 1, 1], [], []>} : vector<16x64xf32>, vector<64x2xf32>, vector<16x2xf32> -> vector<16x2xf32>
    %c0_60 = arith.constant 0 : index
    %c0_61 = arith.constant 0 : index
    %105 = vector.load %arg23[%c0_60, %c0_61] : memref<16x1xf32, #tpu.memory_space<vmem>>, vector<16x1xf32>
    %106 = vector.broadcast %105 : vector<16x1xf32> to vector<16x2xf32>
    %107 = arith.addf %104, %106 : vector<16x2xf32>
    %cst_62 = arith.constant 0.000000e+00 : f32
    %108 = vector.broadcast %cst_62 : f32 to vector<16x2xf32>
    %109 = arith.maximumf %107, %108 : vector<16x2xf32>
    %c0_63 = arith.constant 0 : index
    %c0_64 = arith.constant 0 : index
    %110 = vector.load %arg24[%c0_63, %c0_64] : memref<16x1xf32, #tpu.memory_space<vmem>>, vector<16x1xf32>
    %111 = vector.broadcast %110 : vector<16x1xf32> to vector<16x2xf32>
    %112 = arith.mulf %109, %111 : vector<16x2xf32>
    %c0_65 = arith.constant 0 : index
    %c0_66 = arith.constant 0 : index
    %113 = vector.load %arg25[%c0_65, %c0_66] : memref<16x1xf32, #tpu.memory_space<vmem>>, vector<16x1xf32>
    %114 = vector.broadcast %113 : vector<16x1xf32> to vector<16x2xf32>
    %115 = arith.addf %112, %114 : vector<16x2xf32>
    %c0_67 = arith.constant 0 : index
    %c0_68 = arith.constant 0 : index
    %116 = vector.load %arg26[%c0_67, %c0_68] : memref<4x16xf32, #tpu.memory_space<vmem>>, vector<4x16xf32>
    %cst_69 = arith.constant dense<0.000000e+00> : vector<4x2xf32>
    %117 = tpu.matmul %116, %115, %cst_69 {dimension_numbers = #tpu.dot_dimension_numbers<[1], [0], [0], [1], [0, 0, 1, 1], [], []>} : vector<4x16xf32>, vector<16x2xf32>, vector<4x2xf32> -> vector<4x2xf32>
    %c0_70 = arith.constant 0 : index
    %c0_71 = arith.constant 0 : index
    %118 = vector.load %arg27[%c0_70, %c0_71] : memref<4x1xf32, #tpu.memory_space<vmem>>, vector<4x1xf32>
    %119 = vector.broadcast %118 : vector<4x1xf32> to vector<4x2xf32>
    %120 = arith.addf %117, %119 : vector<4x2xf32>
    %cst_72 = arith.constant 0.000000e+00 : f32
    %121 = vector.broadcast %cst_72 : f32 to vector<4x2xf32>
    %122 = arith.maximumf %120, %121 : vector<4x2xf32>
    %c0_73 = arith.constant 0 : index
    %c0_74 = arith.constant 0 : index
    %123 = vector.load %arg28[%c0_73, %c0_74] : memref<4x1xf32, #tpu.memory_space<vmem>>, vector<4x1xf32>
    %124 = vector.broadcast %123 : vector<4x1xf32> to vector<4x2xf32>
    %125 = arith.mulf %122, %124 : vector<4x2xf32>
    %c0_75 = arith.constant 0 : index
    %c0_76 = arith.constant 0 : index
    %126 = vector.load %arg29[%c0_75, %c0_76] : memref<4x1xf32, #tpu.memory_space<vmem>>, vector<4x1xf32>
    %127 = vector.broadcast %126 : vector<4x1xf32> to vector<4x2xf32>
    %128 = arith.addf %125, %127 : vector<4x2xf32>
    %c0_77 = arith.constant 0 : index
    %c0_78 = arith.constant 0 : index
    %129 = vector.load %arg30[%c0_77, %c0_78] : memref<8x4xf32, #tpu.memory_space<vmem>>, vector<8x4xf32>
    %cst_79 = arith.constant dense<0.000000e+00> : vector<8x2xf32>
    %130 = tpu.matmul %129, %128, %cst_79 {dimension_numbers = #tpu.dot_dimension_numbers<[1], [0], [0], [1], [0, 0, 1, 1], [], []>} : vector<8x4xf32>, vector<4x2xf32>, vector<8x2xf32> -> vector<8x2xf32>
    %c0_80 = arith.constant 0 : index
    %c0_81 = arith.constant 0 : index
    %131 = vector.load %arg31[%c0_80, %c0_81] : memref<8x1xf32, #tpu.memory_space<vmem>>, vector<8x1xf32>
    %132 = vector.broadcast %131 : vector<8x1xf32> to vector<8x2xf32>
    %133 = arith.addf %130, %132 : vector<8x2xf32>
    %cst_82 = arith.constant dense<0xFF800000> : vector<2xf32>
    %134 = vector.multi_reduction <maximumf>, %133, %cst_82 [0] : vector<8x2xf32> to vector<2xf32>
    %135 = vector.shape_cast %134 : vector<2xf32> to vector<1x2xf32>
    %136 = vector.broadcast %135 : vector<1x2xf32> to vector<8x2xf32>
    %137 = arith.subf %133, %136 : vector<8x2xf32>
    %138 = math.exp %137 : vector<8x2xf32>
    %cst_83 = arith.constant dense<0.000000e+00> : vector<2xf32>
    %139 = vector.multi_reduction <add>, %138, %cst_83 [0] : vector<8x2xf32> to vector<2xf32>
    %140 = vector.shape_cast %139 : vector<2xf32> to vector<1x2xf32>
    %141 = tpu.reciprocal %140 {approx = true} : vector<1x2xf32> -> vector<1x2xf32>
    %142 = vector.broadcast %141 : vector<1x2xf32> to vector<8x2xf32>
    %143 = arith.mulf %138, %142 : vector<8x2xf32>
    %c0_84 = arith.constant 0 : index
    %c0_85 = arith.constant 0 : index
    %144 = vector.load %arg32[%c0_84, %c0_85] : memref<8x2xf32, #tpu.memory_space<vmem>>, vector<8x2xf32>
    tpu.vector_store %arg32[%c0_84, %c0_85], %143 {strides = array<i32>} : memref<8x2xf32, #tpu.memory_space<vmem>>, vector<8x2xf32>,
    return
  }
}

</mosaic_0001>

<bundles_post_ra>
// kernel: tpu_custom_call.1
= control target key start
LH: loop header
LB: loop body
LE: loop exit
PB: predicated region body
PF: predicated region fallthrough
CT: control target
= control target key end

     0   :  { %s3348_s6 = smov 1   ;;  %s3349_s10 = smov 2   ;;  %s3845_s0 = inlined_call_operand.smem [shape: u32[33], index: -1, kind: input, shape index: {}] }
   0x1   :  { %s3437_s5 = sld [smem:[%s3845_s0]]   ;;  %s3350_s14 = smov 3  }
   0x2   :  { %s3442_s9 = sld [smem:[%s3845_s0 + %s3348_s6]]   ;;  %s3351_s18 = smov 4  }
   0x3   :  { %s3447_s13 = sld [smem:[%s3845_s0 + %s3349_s10]]   ;;  %s3352_s22 = smov 5  }
   0x4   :  { %s3452_s17 = sld [smem:[%s3845_s0 + %s3350_s14]]   ;;  %s3353_s26 = smov 6  }
   0x5   :  { %s3457_s21 = sld [smem:[%s3845_s0 + %s3351_s18]]   ;;  %s3354_s30 = smov 7  }
   0x6   :  { %s3462_s25 = sld [smem:[%s3845_s0 + %s3352_s22]]   ;;  %s3355_s4 = smov 8  }
   0x7   :  { %3861 = sst [smem:[#allocation71_spill]] %s3437_s5  ;;  %s3356_s10 = smov 9  }
   0x8   :  { %s3467_s29 = sld [smem:[%s3845_s0 + %s3353_s26]]   ;;  %s3357_s15 = smov 10  }
   0x9   :  { %3862 = sst [smem:[#allocation72_spill]] %s3447_s13  ;;  %s3358_s20 = smov 11  }
   0xa   :  { %s3472_s3 = sld [smem:[%s3845_s0 + %s3354_s30]]   ;;  %s3359_s26 = smov 12  }
   0xb   :  { %3863 = sst [smem:[#allocation73_spill]] %s3457_s21  ;;  %s3360_s1 = smov 13  }
   0xc   :  { %s3477_s8 = sld [smem:[%s3845_s0 + %s3355_s4]]   ;;  %s3361_s7 = smov 14  }
   0xd   :  { %s3482_s14 = sld [smem:[%s3845_s0 + %s3356_s10]]   ;;  %s3363_s22 = smov 16  }
   0xe   :  { %3864 = sst [smem:[#allocation74_spill]] %s3467_s29  ;;  %s3364_s28 = smov 17  }
   0xf   :  { %s3487_s19 = sld [smem:[%s3845_s0 + %s3357_s15]]   ;;  %s3362_s15 = smov 15  }
  0x10   :  { %s3492_s24 = sld [smem:[%s3845_s0 + %s3358_s20]]  }
  0x11   :  { %s3497_s30 = sld [smem:[%s3845_s0 + %s3359_s26]]  }
  0x12   :  { %3865 = sst [smem:[#allocation75_spill]] %s3477_s8 }
  0x13   :  { %s3502_s6 = sld [smem:[%s3845_s0 + %s3360_s1]]  }
  0x14   :  { %s3507_s12 = sld [smem:[%s3845_s0 + %s3361_s7]]   ;;  %s3365_s7 = smov 18  }
  0x15   :  { %3866 = sst [smem:[#allocation76_spill]] %s3487_s19 }
  0x16   :  { %s3512_s20 = sld [smem:[%s3845_s0 + %s3362_s15]]   ;;  %s3366_s15 = smov 19  }
  0x17   :  { %3867 = sst [smem:[#allocation77_spill]] %s3497_s30 }
  0x18   :  { %s3517_s27 = sld [smem:[%s3845_s0 + %s3363_s22]]   ;;  %s3367_s22 = smov 20  }
  0x19   :  { %s3522_s4 = sld [smem:[%s3845_s0 + %s3364_s28]]   ;;  %s3368_s28 = smov 21  }
  0x1a   :  { %3868 = sst [smem:[#allocation78_spill]] %s3507_s12 }
  0x1b   :  { %s3527_s12 = sld [smem:[%s3845_s0 + %s3365_s7]]   ;;  %s3369_s7 = smov 22  }
  0x1c   :  { %s3532_s30 = sld [smem:[%s3845_s0 + %s3366_s15]]   ;;  %s3370_s15 = smov 23  }
  0x1d   :  { %s3542_s19 = sld [smem:[%s3845_s0 + %s3368_s28]]   ;;  %s3372_s28 = smov 25  }
  0x1e   :  { %3869 = sst [smem:[#allocation79_spill]] %s3517_s27 }
  0x1f   :  { %s3537_s27 = sld [smem:[%s3845_s0 + %s3367_s22]]   ;;  %s3371_s22 = smov 24  }
  0x20   :  { %s3552_s8 = sld [smem:[%s3845_s0 + %s3370_s15]]   ;;  %s3374_s15 = smov 27  }
  0x21   :  { %3870 = sst [smem:[#allocation80_spill]] %s3527_s12 }
  0x22   :  { %s3547_s12 = sld [smem:[%s3845_s0 + %s3369_s7]]   ;;  %s3373_s7 = smov 26  }
  0x23   :  { %s3562_s29 = sld [smem:[%s3845_s0 + %s3372_s28]]   ;;  %s3376_s28 = smov 29  }
  0x24   :  { %s3572_s21 = sld [smem:[%s3845_s0 + %s3374_s15]]   ;;  %s3378_s15 = smov 31  }
  0x25   :  { %3871 = sst [smem:[#allocation81_spill]] %s3537_s27 }
  0x26   :  { %s3557_s27 = sld [smem:[%s3845_s0 + %s3371_s22]]   ;;  %s3375_s22 = smov 28  }
  0x27   :  { %s3582_s13 = sld [smem:[%s3845_s0 + %s3376_s28]]  }
  0x28   :  { %3872 = sst [smem:[#allocation82_spill]] %s3547_s12 }
  0x29   :  { %s3567_s12 = sld [smem:[%s3845_s0 + %s3373_s7]]   ;;  %s3377_s7 = smov 30  }
  0x2a   :  { %s3592_s5 = sld [smem:[%s3845_s0 + %s3378_s15]]  }
  0x2c   :  { %3873 = sst [smem:[#allocation83_spill]] %s3557_s27 }
  0x2d   :  { %s3577_s27 = sld [smem:[%s3845_s0 + %s3375_s22]]   ;;  %s3379_s22 = smov 32  }
  0x2f   :  { %3874 = sst [smem:[#allocation84_spill]] %s3567_s12 }
  0x30   :  { %s3587_s12 = sld [smem:[%s3845_s0 + %s3377_s7]]  }
  0x33   :  { %3875 = sst [smem:[#allocation85_spill]] %s3577_s27 }
  0x34   :  { %s3597_s27 = sld [smem:[%s3845_s0 + %s3379_s22]]  }
  0x35   :  { %70 = vsyncpa [#allocation3], 0 }
  0x36   :  { %71 = vsyncpa [#allocation6], 0 }
  0x37   :  { %72 = vsyncpa [#allocation9], 0 }
  0x38   :  { %73 = vsyncpa [#allocation12], 0 }
  0x39   :  { %74 = vsyncpa [#allocation15], 0 }
  0x3a   :  { %75 = vsyncpa [#allocation18], 0 }
  0x3b   :  { %76 = vsyncpa [#allocation21], 0 }
  0x3c   :  { %77 = vsyncpa [#allocation24], 0 }
  0x3d   :  { %78 = vsyncpa [#allocation27], 0 }
  0x3e   :  { %79 = vsyncpa [#allocation30], 0 }
  0x3f   :  { %80 = vsyncpa [#allocation33], 0 }
  0x40   :  { %81 = vsyncpa [#allocation36], 0 }
  0x41   :  { %82 = vsyncpa [#allocation39], 0 }
  0x42   :  { %83 = vsyncpa [#allocation42], 0 }
  0x43   :  { %84 = vsyncpa [#allocation45], 0 }
  0x44   :  { %85 = vsyncpa [#allocation48], 0 }
  0x45   :  { %86 = vsyncpa [#allocation51], 0 }
  0x46   :  { %87 = vsyncpa [#allocation4], 0  ;;  %s3380_s0 = smov [#allocation5]   ;;  %s2586_s1 = scalar_lea.hbm %s3442_s9, 896 }
  0x47   :  { %s103_s28 = sshll.u32 %s3380_s0, 4  ;;  %p2587_p0 = scmp.ne.s32.totalorder %s3442_s9, %s2586_s1  ;;  %s104_s28 = int_to_ptr.vmem [resolvable:$true] %s103_s28 }
  0x48   :  { %p2590_p1 = scmp.lt.u32.totalorder %s2586_s1, %s3442_s9 }
  0x4a   :  { %p2592_p2 = pnand %p2590_p1, %p2587_p0 }
  0x4c   :  { %2595 = shalt.err (!%p2592_p2)
}
  0x4d   :  { %s2596_s2 = scalar_lea.vmem %s104_s28, 896  ;;  %p2601_p4 = scmp.lt.s32.totalorder %s104_s28, %s104_s28 }
  0x4e   :  { %p2597_p3 = scmp.ne.s32.totalorder %s104_s28, %s2596_s2  ;;  %p2602_p5 = scmp.lt.s32.totalorder %s2596_s2, %s2596_s2 }
  0x50   :  { %p2603_p6 = por %p2602_p5, %p2601_p4 }
  0x52   :  { %p2604_p7 = pnand %p2603_p6, %p2597_p3 }
  0x54   :  { %2607 = shalt.err (!%p2604_p7)
}
  0x55   :  { %s3381_s7 = smov 128   ;;  %s3382_s10 = smov 8  }
  0x56   :  { %109 = dma.hbm_to_vmem [thread:$0]  %s3442_s9, 896, %s104_s28, [#allocation6], %s3381_s7, %s3381_s7, %s3382_s10  }
  0x57   :  { %s3383_s11 = smov [#allocation8]   ;;  %s3384_s16 = smov [#allocation11]  }
  0x58   :  { %s127_s15 = sshll.u32 %s3383_s11, 4  ;;  %s151_s18 = sshll.u32 %s3384_s16, 4  ;;  %s128_s15 = int_to_ptr.vmem [resolvable:$true] %s127_s15  ;;  %s152_s18 = int_to_ptr.vmem [resolvable:$true] %s151_s18 }
  0x59   :  { %s2608_s22 = scalar_lea.hbm %s3452_s17, 256 }
  0x5a   :  { %p2609_p8 = scmp.ne.s32.totalorder %s3452_s17, %s2608_s22  ;;  %p2612_p9 = scmp.lt.u32.totalorder %s2608_s22, %s3452_s17 }
  0x5c   :  { %p2614_p10 = pnand %p2612_p9, %p2609_p8 }
  0x5e   :  { %2617 = shalt.err (!%p2614_p10)
}
  0x5f   :  { %s2618_s23 = scalar_lea.vmem %s128_s15, 256  ;;  %p2623_p12 = scmp.lt.s32.totalorder %s128_s15, %s128_s15 }
  0x60   :  { %p2619_p11 = scmp.ne.s32.totalorder %s128_s15, %s2618_s23  ;;  %p2624_p13 = scmp.lt.s32.totalorder %s2618_s23, %s2618_s23 }
  0x62   :  { %p2625_p0 = por %p2624_p13, %p2623_p12 }
  0x64   :  { %p2626_p1 = pnand %p2625_p0, %p2619_p11 }
  0x66   :  { %2629 = shalt.err (!%p2626_p1)
}
  0x67   :  { %133 = dma.hbm_to_vmem [thread:$0]  %s3452_s17, 256, %s128_s15, [#allocation9], %s3381_s7, %s3381_s7, %s3382_s10  }
  0x68   :  { %s2630_s9 = scalar_lea.hbm %s3462_s25, 256 }
  0x69   :  { %p2631_p2 = scmp.ne.s32.totalorder %s3462_s25, %s2630_s9  ;;  %p2634_p3 = scmp.lt.u32.totalorder %s2630_s9, %s3462_s25 }
  0x6b   :  { %p2636_p4 = pnand %p2634_p3, %p2631_p2 }
  0x6d   :  { %2639 = shalt.err (!%p2636_p4)
}
  0x6e   :  { %s2640_s26 = scalar_lea.vmem %s152_s18, 256  ;;  %p2645_p6 = scmp.lt.s32.totalorder %s152_s18, %s152_s18 }
  0x6f   :  { %p2641_p5 = scmp.ne.s32.totalorder %s152_s18, %s2640_s26  ;;  %p2646_p7 = scmp.lt.s32.totalorder %s2640_s26, %s2640_s26 }
  0x71   :  { %p2647_p8 = por %p2646_p7, %p2645_p6 }
  0x73   :  { %p2648_p9 = pnand %p2647_p8, %p2641_p5 }
  0x75   :  { %2651 = shalt.err (!%p2648_p9)
}
  0x76   :  { %157 = dma.hbm_to_vmem [thread:$0]  %s3462_s25, 256, %s152_s18, [#allocation12], %s3381_s7, %s3381_s7, %s3382_s10  }
  0x77   :  { %s3385_s17 = smov [#allocation14]   ;;  %s3386_s28 = smov [#allocation17]  }
  0x78   :  { %s175_s0 = sshll.u32 %s3385_s17, 4  ;;  %s199_s1 = sshll.u32 %s3386_s28, 4  ;;  %s176_s0 = int_to_ptr.vmem [resolvable:$true] %s175_s0  ;;  %s200_s1 = int_to_ptr.vmem [resolvable:$true] %s199_s1 }
  0x79   :  { %s2652_s2 = scalar_lea.hbm %s3472_s3, 256 }
  0x7a   :  { %p2653_p10 = scmp.ne.s32.totalorder %s3472_s3, %s2652_s2  ;;  %p2656_p11 = scmp.lt.u32.totalorder %s2652_s2, %s3472_s3 }
  0x7c   :  { %p2658_p12 = pnand %p2656_p11, %p2653_p10 }
  0x7e   :  { %2661 = shalt.err (!%p2658_p12)
}
  0x7f   :  { %s2662_s11 = scalar_lea.vmem %s176_s0, 256  ;;  %p2667_p0 = scmp.lt.s32.totalorder %s176_s0, %s176_s0 }
  0x80   :  { %p2663_p13 = scmp.ne.s32.totalorder %s176_s0, %s2662_s11  ;;  %p2668_p1 = scmp.lt.s32.totalorder %s2662_s11, %s2662_s11 }
  0x82   :  { %p2669_p2 = por %p2668_p1, %p2667_p0 }
  0x84   :  { %p2670_p3 = pnand %p2669_p2, %p2663_p13 }
  0x86   :  { %2673 = shalt.err (!%p2670_p3)
}
  0x87   :  { %181 = dma.hbm_to_vmem [thread:$0]  %s3472_s3, 256, %s176_s0, [#allocation15], %s3381_s7, %s3381_s7, %s3382_s10  }
  0x88   :  { %s2674_s25 = scalar_lea.hbm %s3482_s14, 256 }
  0x89   :  { %p2675_p4 = scmp.ne.s32.totalorder %s3482_s14, %s2674_s25  ;;  %p2678_p5 = scmp.lt.u32.totalorder %s2674_s25, %s3482_s14 }
  0x8b   :  { %p2680_p6 = pnand %p2678_p5, %p2675_p4 }
  0x8d   :  { %2683 = shalt.err (!%p2680_p6)
}
  0x8e   :  { %s2684_s15 = scalar_lea.vmem %s200_s1, 256  ;;  %p2689_p8 = scmp.lt.s32.totalorder %s200_s1, %s200_s1 }
  0x8f   :  { %p2685_p7 = scmp.ne.s32.totalorder %s200_s1, %s2684_s15  ;;  %p2690_p9 = scmp.lt.s32.totalorder %s2684_s15, %s2684_s15 }
  0x91   :  { %p2691_p10 = por %p2690_p9, %p2689_p8 }
  0x93   :  { %p2692_p11 = pnand %p2691_p10, %p2685_p7 }
  0x95   :  { %2695 = shalt.err (!%p2692_p11)
}
  0x96   :  { %205 = dma.hbm_to_vmem [thread:$0]  %s3482_s14, 256, %s200_s1, [#allocation18], %s3381_s7, %s3381_s7, %s3382_s10  }
  0x97   :  { %s3387_s3 = smov [#allocation20]   ;;  %s3388_s18 = smov [#allocation23]  }
  0x98   :  { %s223_s16 = sshll.u32 %s3387_s3, 4  ;;  %s247_s22 = sshll.u32 %s3388_s18, 4  ;;  %s224_s16 = int_to_ptr.vmem [resolvable:$true] %s223_s16  ;;  %s248_s22 = int_to_ptr.vmem [resolvable:$true] %s247_s22 }
  0x99   :  { %s2696_s23 = scalar_lea.hbm %s3492_s24, 256 }
  0x9a   :  { %p2697_p12 = scmp.ne.s32.totalorder %s3492_s24, %s2696_s23  ;;  %p2700_p13 = scmp.lt.u32.totalorder %s2696_s23, %s3492_s24 }
  0x9c   :  { %p2702_p0 = pnand %p2700_p13, %p2697_p12 }
  0x9e   :  { %2705 = shalt.err (!%p2702_p0)
}
  0x9f   :  { %s2706_s9 = scalar_lea.vmem %s224_s16, 256  ;;  %p2711_p2 = scmp.lt.s32.totalorder %s224_s16, %s224_s16 }
  0xa0   :  { %p2707_p1 = scmp.ne.s32.totalorder %s224_s16, %s2706_s9  ;;  %p2712_p3 = scmp.lt.s32.totalorder %s2706_s9, %s2706_s9 }
  0xa2   :  { %p2713_p4 = por %p2712_p3, %p2711_p2 }
  0xa4   :  { %p2714_p5 = pnand %p2713_p4, %p2707_p1 }
  0xa6   :  { %2717 = shalt.err (!%p2714_p5)
}
  0xa7   :  { %229 = dma.hbm_to_vmem [thread:$0]  %s3492_s24, 256, %s224_s16, [#allocation21], %s3381_s7, %s3381_s7, %s3382_s10  }
  0xa8   :  { %s2718_s14 = scalar_lea.hbm %s3502_s6, 256 }
  0xa9   :  { %p2719_p6 = scmp.ne.s32.totalorder %s3502_s6, %s2718_s14  ;;  %p2722_p7 = scmp.lt.u32.totalorder %s2718_s14, %s3502_s6 }
  0xab   :  { %p2724_p8 = pnand %p2722_p7, %p2719_p6 }
  0xad   :  { %2727 = shalt.err (!%p2724_p8)
}
  0xae   :  { %s2728_s26 = scalar_lea.vmem %s248_s22, 256  ;;  %p2733_p10 = scmp.lt.s32.totalorder %s248_s22, %s248_s22 }
  0xaf   :  { %p2729_p9 = scmp.ne.s32.totalorder %s248_s22, %s2728_s26  ;;  %p2734_p11 = scmp.lt.s32.totalorder %s2728_s26, %s2728_s26 }
  0xb1   :  { %p2735_p12 = por %p2734_p11, %p2733_p10 }
  0xb3   :  { %p2736_p13 = pnand %p2735_p12, %p2729_p9 }
  0xb5   :  { %2739 = shalt.err (!%p2736_p13)
}
  0xb6   :  { %253 = dma.hbm_to_vmem [thread:$0]  %s3502_s6, 256, %s248_s22, [#allocation24], %s3381_s7, %s3381_s7, %s3382_s10  }
  0xb7   :  { %s3389_s24 = smov [#allocation26]   ;;  %s3390_s0 = smov [#allocation29]  }
  0xb8   :  { %s271_s17 = sshll.u32 %s3389_s24, 4  ;;  %s295_s28 = sshll.u32 %s3390_s0, 4  ;;  %s272_s17 = int_to_ptr.vmem [resolvable:$true] %s271_s17  ;;  %s296_s28 = int_to_ptr.vmem [resolvable:$true] %s295_s28 }
  0xb9   :  { %s2740_s1 = scalar_lea.hbm %s3512_s20, 512 }
  0xba   :  { %p2741_p0 = scmp.ne.s32.totalorder %s3512_s20, %s2740_s1  ;;  %p2744_p1 = scmp.lt.u32.totalorder %s2740_s1, %s3512_s20 }
  0xbc   :  { %p2746_p2 = pnand %p2744_p1, %p2741_p0 }
  0xbe   :  { %2749 = shalt.err (!%p2746_p2)
}
  0xbf   :  { %s2750_s2 = scalar_lea.vmem %s272_s17, 512  ;;  %p2755_p4 = scmp.lt.s32.totalorder %s272_s17, %s272_s17 }
  0xc0   :  { %p2751_p3 = scmp.ne.s32.totalorder %s272_s17, %s2750_s2  ;;  %p2756_p5 = scmp.lt.s32.totalorder %s2750_s2, %s2750_s2 }
  0xc2   :  { %p2757_p6 = por %p2756_p5, %p2755_p4 }
  0xc4   :  { %p2758_p7 = pnand %p2757_p6, %p2751_p3 }
  0xc6   :  { %2761 = shalt.err (!%p2758_p7)
}
  0xc7   :  { %277 = dma.hbm_to_vmem [thread:$0]  %s3512_s20, 512, %s272_s17, [#allocation27], %s3381_s7, %s3381_s7, %s3382_s10  }
  0xc8   :  { %s2762_s6 = scalar_lea.hbm %s3522_s4, 512 }
  0xc9   :  { %p2763_p8 = scmp.ne.s32.totalorder %s3522_s4, %s2762_s6  ;;  %p2766_p9 = scmp.lt.u32.totalorder %s2762_s6, %s3522_s4 }
  0xcb   :  { %p2768_p10 = pnand %p2766_p9, %p2763_p8 }
  0xcd   :  { %2771 = shalt.err (!%p2768_p10)
}
  0xce   :  { %s2772_s11 = scalar_lea.vmem %s296_s28, 512  ;;  %p2777_p12 = scmp.lt.s32.totalorder %s296_s28, %s296_s28 }
  0xcf   :  { %p2773_p11 = scmp.ne.s32.totalorder %s296_s28, %s2772_s11  ;;  %p2778_p13 = scmp.lt.s32.totalorder %s2772_s11, %s2772_s11 }
  0xd1   :  { %p2779_p0 = por %p2778_p13, %p2777_p12 }
  0xd3   :  { %p2780_p1 = pnand %p2779_p0, %p2773_p11 }
  0xd5   :  { %2783 = shalt.err (!%p2780_p1)
}
  0xd6   :  { %301 = dma.hbm_to_vmem [thread:$0]  %s3522_s4, 512, %s296_s28, [#allocation30], %s3381_s7, %s3381_s7, %s3382_s10  }
  0xd7   :  { %s3391_s20 = smov [#allocation32]   ;;  %s3392_s15 = smov [#allocation35]  }
  0xd8   :  { %s319_s25 = sshll.u32 %s3391_s20, 4  ;;  %s343_s3 = sshll.u32 %s3392_s15, 4  ;;  %s320_s25 = int_to_ptr.vmem [resolvable:$true] %s319_s25  ;;  %s344_s3 = int_to_ptr.vmem [resolvable:$true] %s343_s3 }
  0xd9   :  { %s2784_s16 = scalar_lea.hbm %s3532_s30, 512 }
  0xda   :  { %p2785_p2 = scmp.ne.s32.totalorder %s3532_s30, %s2784_s16  ;;  %p2788_p3 = scmp.lt.u32.totalorder %s2784_s16, %s3532_s30 }
  0xdc   :  { %p2790_p4 = pnand %p2788_p3, %p2785_p2 }
  0xde   :  { %2793 = shalt.err (!%p2790_p4)
}
  0xdf   :  { %s2794_s18 = scalar_lea.vmem %s320_s25, 512  ;;  %p2799_p6 = scmp.lt.s32.totalorder %s320_s25, %s320_s25 }
  0xe0   :  { %p2795_p5 = scmp.ne.s32.totalorder %s320_s25, %s2794_s18  ;;  %p2800_p7 = scmp.lt.s32.totalorder %s2794_s18, %s2794_s18 }
  0xe2   :  { %p2801_p8 = por %p2800_p7, %p2799_p6 }
  0xe4   :  { %p2802_p9 = pnand %p2801_p8, %p2795_p5 }
  0xe6   :  { %2805 = shalt.err (!%p2802_p9)
}
  0xe7   :  { %325 = dma.hbm_to_vmem [thread:$0]  %s3532_s30, 512, %s320_s25, [#allocation33], %s3381_s7, %s3381_s7, %s3382_s10  }
  0xe8   :  { %s2806_s4 = scalar_lea.hbm %s3542_s19, 512 }
  0xe9   :  { %p2807_p10 = scmp.ne.s32.totalorder %s3542_s19, %s2806_s4  ;;  %p2810_p11 = scmp.lt.u32.totalorder %s2806_s4, %s3542_s19 }
  0xeb   :  { %p2812_p12 = pnand %p2810_p11, %p2807_p10 }
  0xed   :  { %2815 = shalt.err (!%p2812_p12)
}
  0xee   :  { %s2816_s22 = scalar_lea.vmem %s344_s3, 512  ;;  %p2821_p0 = scmp.lt.s32.totalorder %s344_s3, %s344_s3 }
  0xef   :  { %p2817_p13 = scmp.ne.s32.totalorder %s344_s3, %s2816_s22  ;;  %p2822_p1 = scmp.lt.s32.totalorder %s2816_s22, %s2816_s22 }
  0xf1   :  { %p2823_p2 = por %p2822_p1, %p2821_p0 }
  0xf3   :  { %p2824_p3 = pnand %p2823_p2, %p2817_p13 }
  0xf5   :  { %2827 = shalt.err (!%p2824_p3)
}
  0xf6   :  { %349 = dma.hbm_to_vmem [thread:$0]  %s3542_s19, 512, %s344_s3, [#allocation36], %s3381_s7, %s3381_s7, %s3382_s10  }
  0xf7   :  { %s3393_s30 = smov [#allocation38]   ;;  %s3394_s9 = smov [#allocation41]  }
  0xf8   :  { %s367_s23 = sshll.u32 %s3393_s30, 4  ;;  %s391_s14 = sshll.u32 %s3394_s9, 4  ;;  %s368_s23 = int_to_ptr.vmem [resolvable:$true] %s367_s23  ;;  %s392_s14 = int_to_ptr.vmem [resolvable:$true] %s391_s14 }
  0xf9   :  { %s2828_s26 = scalar_lea.hbm %s3552_s8, 256 }
  0xfa   :  { %p2829_p4 = scmp.ne.s32.totalorder %s3552_s8, %s2828_s26  ;;  %p2832_p5 = scmp.lt.u32.totalorder %s2828_s26, %s3552_s8 }
  0xfc   :  { %p2834_p6 = pnand %p2832_p5, %p2829_p4 }
  0xfe   :  { %2837 = shalt.err (!%p2834_p6)
}
  0xff   :  { %s2838_s24 = scalar_lea.vmem %s368_s23, 256  ;;  %p2843_p8 = scmp.lt.s32.totalorder %s368_s23, %s368_s23 }
 0x100   :  { %p2839_p7 = scmp.ne.s32.totalorder %s368_s23, %s2838_s24  ;;  %p2844_p9 = scmp.lt.s32.totalorder %s2838_s24, %s2838_s24 }
 0x102   :  { %p2845_p10 = por %p2844_p9, %p2843_p8 }
 0x104   :  { %p2846_p11 = pnand %p2845_p10, %p2839_p7 }
 0x106   :  { %2849 = shalt.err (!%p2846_p11)
}
 0x107   :  { %373 = dma.hbm_to_vmem [thread:$0]  %s3552_s8, 256, %s368_s23, [#allocation39], %s3381_s7, %s3381_s7, %s3382_s10  }
 0x108   :  { %s2850_s19 = scalar_lea.hbm %s3562_s29, 256 }
 0x109   :  { %p2851_p12 = scmp.ne.s32.totalorder %s3562_s29, %s2850_s19  ;;  %p2854_p13 = scmp.lt.u32.totalorder %s2850_s19, %s3562_s29 }
 0x10b   :  { %p2856_p0 = pnand %p2854_p13, %p2851_p12 }
 0x10d   :  { %2859 = shalt.err (!%p2856_p0)
}
 0x10e   :  { %s2860_s17 = scalar_lea.vmem %s392_s14, 256  ;;  %p2865_p2 = scmp.lt.s32.totalorder %s392_s14, %s392_s14 }
 0x10f   :  { %p2861_p1 = scmp.ne.s32.totalorder %s392_s14, %s2860_s17  ;;  %p2866_p3 = scmp.lt.s32.totalorder %s2860_s17, %s2860_s17 }
 0x111   :  { %p2867_p4 = por %p2866_p3, %p2865_p2 }
 0x113   :  { %p2868_p5 = pnand %p2867_p4, %p2861_p1 }
 0x115   :  { %2871 = shalt.err (!%p2868_p5)
}
 0x116   :  { %397 = dma.hbm_to_vmem [thread:$0]  %s3562_s29, 256, %s392_s14, [#allocation42], %s3381_s7, %s3381_s7, %s3382_s10  }
 0x117   :  { %s3395_s8 = smov [#allocation44]   ;;  %s3396_s28 = smov [#allocation47]  }
 0x118   :  { %s414_s0 = sshll.u32 %s3395_s8, 4  ;;  %s434_s1 = sshll.u32 %s3396_s28, 4  ;;  %s415_s0 = int_to_ptr.vmem [resolvable:$true] %s414_s0  ;;  %s435_s1 = int_to_ptr.vmem [resolvable:$true] %s434_s1 }
 0x119   :  { %s2872_s2 = scalar_lea.hbm %s3572_s21, 64 }
 0x11a   :  { %p2873_p6 = scmp.ne.s32.totalorder %s3572_s21, %s2872_s2  ;;  %p2876_p7 = scmp.lt.u32.totalorder %s2872_s2, %s3572_s21 }
 0x11c   :  { %p2878_p8 = pnand %p2876_p7, %p2873_p6 }
 0x11e   :  { %2881 = shalt.err (!%p2878_p8)
}
 0x11f   :  { %s2882_s6 = scalar_lea.vmem %s415_s0, 64  ;;  %p2887_p10 = scmp.lt.s32.totalorder %s415_s0, %s415_s0 }
 0x120   :  { %p2883_p9 = scmp.ne.s32.totalorder %s415_s0, %s2882_s6  ;;  %p2888_p11 = scmp.lt.s32.totalorder %s2882_s6, %s2882_s6 }
 0x122   :  { %p2889_p12 = por %p2888_p11, %p2887_p10 }
 0x124   :  { %p2890_p13 = pnand %p2889_p12, %p2883_p9 }
 0x126   :  { %2893 = shalt.err (!%p2890_p13)
}
 0x127   :  { %417 = dma.hbm_to_vmem [thread:$0]  %s3572_s21, 64, %s415_s0, [#allocation45]  }
 0x128   :  { %s2894_s29 = scalar_lea.hbm %s3582_s13, 64 }
 0x129   :  { %p2895_p0 = scmp.ne.s32.totalorder %s3582_s13, %s2894_s29  ;;  %p2898_p1 = scmp.lt.u32.totalorder %s2894_s29, %s3582_s13 }
 0x12b   :  { %p2900_p2 = pnand %p2898_p1, %p2895_p0 }
 0x12d   :  { %2903 = shalt.err (!%p2900_p2)
}
 0x12e   :  { %s2904_s11 = scalar_lea.vmem %s435_s1, 64  ;;  %p2909_p4 = scmp.lt.s32.totalorder %s435_s1, %s435_s1 }
 0x12f   :  { %p2905_p3 = scmp.ne.s32.totalorder %s435_s1, %s2904_s11  ;;  %p2910_p5 = scmp.lt.s32.totalorder %s2904_s11, %s2904_s11 }
 0x131   :  { %p2911_p6 = por %p2910_p5, %p2909_p4 }
 0x133   :  { %p2912_p7 = pnand %p2911_p6, %p2905_p3 }
 0x135   :  { %2915 = shalt.err (!%p2912_p7)
}
 0x136   :  { %s3876_s20 = sld [smem:[#allocation71_spill]]  ;;  %s3397_s25 = smov [#allocation2]  }
 0x137   :  { %437 = dma.hbm_to_vmem [thread:$0]  %s3582_s13, 64, %s435_s1, [#allocation48]  }
 0x138   :  { %s94_s21 = sshll.u32 %s3397_s25, 4  ;;  %s3398_s15 = smov [#allocation7]   ;;  %s95_s21 = int_to_ptr.vmem [resolvable:$true] %s94_s21 }
 0x139   :  { %s115_s3 = sshll.u32 %s3398_s15, 4  ;;  %s116_s3 = int_to_ptr.vmem [resolvable:$true] %s115_s3 }
 0x13c   :  { %s2916_s16 = scalar_lea.hbm %s3876_s20, 128 }
 0x13d   :  { %p2917_p8 = scmp.ne.s32.totalorder %s3876_s20, %s2916_s16  ;;  %p2920_p9 = scmp.lt.u32.totalorder %s2916_s16, %s3876_s20 }
 0x13f   :  { %p2922_p10 = pnand %p2920_p9, %p2917_p8 }
 0x141   :  { %2925 = shalt.err (!%p2922_p10)
}
 0x142   :  { %s2926_s18 = scalar_lea.vmem %s95_s21, 128  ;;  %p2931_p12 = scmp.lt.s32.totalorder %s95_s21, %s95_s21 }
 0x143   :  { %p2927_p11 = scmp.ne.s32.totalorder %s95_s21, %s2926_s18  ;;  %p2932_p13 = scmp.lt.s32.totalorder %s2926_s18, %s2926_s18 }
 0x145   :  { %p2933_p0 = por %p2932_p13, %p2931_p12 }
 0x147   :  { %p2934_p1 = pnand %p2933_p0, %p2927_p11 }
 0x149   :  { %2937 = shalt.err (!%p2934_p1)
}
 0x14a   :  { %s3877_s4 = sld [smem:[#allocation72_spill]] }
 0x14b   :  { %97 = dma.hbm_to_vmem [thread:$0]  %s3876_s20, 128, %s95_s21, [#allocation3]  }
 0x150   :  { %s2938_s13 = scalar_lea.hbm %s3877_s4, 256 }
 0x151   :  { %p2939_p2 = scmp.ne.s32.totalorder %s3877_s4, %s2938_s13  ;;  %p2942_p3 = scmp.lt.u32.totalorder %s2938_s13, %s3877_s4 }
 0x153   :  { %p2944_p4 = pnand %p2942_p3, %p2939_p2 }
 0x155   :  { %2947 = shalt.err (!%p2944_p4)
}
 0x156   :  { %s2948_s22 = scalar_lea.vmem %s116_s3, 256  ;;  %p2953_p6 = scmp.lt.s32.totalorder %s116_s3, %s116_s3 }
 0x157   :  { %p2949_p5 = scmp.ne.s32.totalorder %s116_s3, %s2948_s22  ;;  %p2954_p7 = scmp.lt.s32.totalorder %s2948_s22, %s2948_s22 }
 0x159   :  { %p2955_p8 = por %p2954_p7, %p2953_p6 }
 0x15b   :  { %p2956_p9 = pnand %p2955_p8, %p2949_p5 }
 0x15d   :  { %2959 = shalt.err (!%p2956_p9)
}
 0x15e   :  { %s3878_s30 = sld [smem:[#allocation73_spill]]  ;;  %s3399_s23 = smov [#allocation10]  }
 0x15f   :  { %121 = dma.hbm_to_vmem [thread:$0]  %s3877_s4, 256, %s116_s3, [#allocation6], %s3381_s7, %s3381_s7, %s3382_s10  }
 0x160   :  { %s139_s9 = sshll.u32 %s3399_s23, 4  ;;  %s3400_s14 = smov [#allocation13]   ;;  %s140_s9 = int_to_ptr.vmem [resolvable:$true] %s139_s9 }
 0x161   :  { %s163_s26 = sshll.u32 %s3400_s14, 4  ;;  %s164_s26 = int_to_ptr.vmem [resolvable:$true] %s163_s26 }
 0x164   :  { %s2960_s24 = scalar_lea.hbm %s3878_s30, 256 }
 0x165   :  { %p2961_p10 = scmp.ne.s32.totalorder %s3878_s30, %s2960_s24  ;;  %p2964_p11 = scmp.lt.u32.totalorder %s2960_s24, %s3878_s30 }
 0x167   :  { %p2966_p12 = pnand %p2964_p11, %p2961_p10 }
 0x169   :  { %2969 = shalt.err (!%p2966_p12)
}
 0x16a   :  { %s2970_s19 = scalar_lea.vmem %s140_s9, 256  ;;  %p2975_p0 = scmp.lt.s32.totalorder %s140_s9, %s140_s9 }
 0x16b   :  { %p2971_p13 = scmp.ne.s32.totalorder %s140_s9, %s2970_s19  ;;  %p2976_p1 = scmp.lt.s32.totalorder %s2970_s19, %s2970_s19 }
 0x16d   :  { %p2977_p2 = por %p2976_p1, %p2975_p0 }
 0x16f   :  { %p2978_p3 = pnand %p2977_p2, %p2971_p13 }
 0x171   :  { %2981 = shalt.err (!%p2978_p3)
}
 0x172   :  { %s3879_s17 = sld [smem:[#allocation74_spill]] }
 0x173   :  { %145 = dma.hbm_to_vmem [thread:$0]  %s3878_s30, 256, %s140_s9, [#allocation9], %s3381_s7, %s3381_s7, %s3382_s10  }
 0x178   :  { %s2982_s8 = scalar_lea.hbm %s3879_s17, 256 }
 0x179   :  { %p2983_p4 = scmp.ne.s32.totalorder %s3879_s17, %s2982_s8  ;;  %p2986_p5 = scmp.lt.u32.totalorder %s2982_s8, %s3879_s17 }
 0x17b   :  { %p2988_p6 = pnand %p2986_p5, %p2983_p4 }
 0x17d   :  { %2991 = shalt.err (!%p2988_p6)
}
 0x17e   :  { %s2992_s0 = scalar_lea.vmem %s164_s26, 256  ;;  %p2997_p8 = scmp.lt.s32.totalorder %s164_s26, %s164_s26 }
 0x17f   :  { %p2993_p7 = scmp.ne.s32.totalorder %s164_s26, %s2992_s0  ;;  %p2998_p9 = scmp.lt.s32.totalorder %s2992_s0, %s2992_s0 }
 0x181   :  { %p2999_p10 = por %p2998_p9, %p2997_p8 }
 0x183   :  { %p3000_p11 = pnand %p2999_p10, %p2993_p7 }
 0x185   :  { %3003 = shalt.err (!%p3000_p11)
}
 0x186   :  { %s3880_s28 = sld [smem:[#allocation75_spill]]  ;;  %s3401_s1 = smov [#allocation16]  }
 0x187   :  { %169 = dma.hbm_to_vmem [thread:$0]  %s3879_s17, 256, %s164_s26, [#allocation12], %s3381_s7, %s3381_s7, %s3382_s10  }
 0x188   :  { %s187_s2 = sshll.u32 %s3401_s1, 4  ;;  %s3402_s6 = smov [#allocation19]   ;;  %s188_s2 = int_to_ptr.vmem [resolvable:$true] %s187_s2 }
 0x189   :  { %s211_s29 = sshll.u32 %s3402_s6, 4  ;;  %s212_s29 = int_to_ptr.vmem [resolvable:$true] %s211_s29 }
 0x18c   :  { %s3004_s11 = scalar_lea.hbm %s3880_s28, 256 }
 0x18d   :  { %p3005_p12 = scmp.ne.s32.totalorder %s3880_s28, %s3004_s11  ;;  %p3008_p13 = scmp.lt.u32.totalorder %s3004_s11, %s3880_s28 }
 0x18f   :  { %p3010_p0 = pnand %p3008_p13, %p3005_p12 }
 0x191   :  { %3013 = shalt.err (!%p3010_p0)
}
 0x192   :  { %s3014_s20 = scalar_lea.vmem %s188_s2, 256  ;;  %p3019_p2 = scmp.lt.s32.totalorder %s188_s2, %s188_s2 }
 0x193   :  { %p3015_p1 = scmp.ne.s32.totalorder %s188_s2, %s3014_s20  ;;  %p3020_p3 = scmp.lt.s32.totalorder %s3014_s20, %s3014_s20 }
 0x195   :  { %p3021_p4 = por %p3020_p3, %p3019_p2 }
 0x197   :  { %p3022_p5 = pnand %p3021_p4, %p3015_p1 }
 0x199   :  { %3025 = shalt.err (!%p3022_p5)
}
 0x19a   :  { %s3881_s25 = sld [smem:[#allocation76_spill]] }
 0x19b   :  { %193 = dma.hbm_to_vmem [thread:$0]  %s3880_s28, 256, %s188_s2, [#allocation15], %s3381_s7, %s3381_s7, %s3382_s10  }
 0x1a0   :  { %s3026_s21 = scalar_lea.hbm %s3881_s25, 256 }
 0x1a1   :  { %p3027_p6 = scmp.ne.s32.totalorder %s3881_s25, %s3026_s21  ;;  %p3030_p7 = scmp.lt.u32.totalorder %s3026_s21, %s3881_s25 }
 0x1a3   :  { %p3032_p8 = pnand %p3030_p7, %p3027_p6 }
 0x1a5   :  { %3035 = shalt.err (!%p3032_p8)
}
 0x1a6   :  { %s3036_s15 = scalar_lea.vmem %s212_s29, 256  ;;  %p3041_p10 = scmp.lt.s32.totalorder %s212_s29, %s212_s29 }
 0x1a7   :  { %p3037_p9 = scmp.ne.s32.totalorder %s212_s29, %s3036_s15  ;;  %p3042_p11 = scmp.lt.s32.totalorder %s3036_s15, %s3036_s15 }
 0x1a9   :  { %p3043_p12 = por %p3042_p11, %p3041_p10 }
 0x1ab   :  { %p3044_p13 = pnand %p3043_p12, %p3037_p9 }
 0x1ad   :  { %3047 = shalt.err (!%p3044_p13)
}
 0x1ae   :  { %s3882_s3 = sld [smem:[#allocation77_spill]]  ;;  %s3403_s16 = smov [#allocation22]  }
 0x1af   :  { %217 = dma.hbm_to_vmem [thread:$0]  %s3881_s25, 256, %s212_s29, [#allocation18], %s3381_s7, %s3381_s7, %s3382_s10  }
 0x1b0   :  { %s235_s18 = sshll.u32 %s3403_s16, 4  ;;  %s3404_s4 = smov [#allocation25]   ;;  %s236_s18 = int_to_ptr.vmem [resolvable:$true] %s235_s18 }
 0x1b1   :  { %s259_s13 = sshll.u32 %s3404_s4, 4  ;;  %s260_s13 = int_to_ptr.vmem [resolvable:$true] %s259_s13 }
 0x1b4   :  { %s3048_s22 = scalar_lea.hbm %s3882_s3, 256 }
 0x1b5   :  { %p3049_p0 = scmp.ne.s32.totalorder %s3882_s3, %s3048_s22  ;;  %p3052_p1 = scmp.lt.u32.totalorder %s3048_s22, %s3882_s3 }
 0x1b7   :  { %p3054_p2 = pnand %p3052_p1, %p3049_p0 }
 0x1b9   :  { %3057 = shalt.err (!%p3054_p2)
}
 0x1ba   :  { %s3058_s30 = scalar_lea.vmem %s236_s18, 256  ;;  %p3063_p4 = scmp.lt.s32.totalorder %s236_s18, %s236_s18 }
 0x1bb   :  { %p3059_p3 = scmp.ne.s32.totalorder %s236_s18, %s3058_s30  ;;  %p3064_p5 = scmp.lt.s32.totalorder %s3058_s30, %s3058_s30 }
 0x1bd   :  { %p3065_p6 = por %p3064_p5, %p3063_p4 }
 0x1bf   :  { %p3066_p7 = pnand %p3065_p6, %p3059_p3 }
 0x1c1   :  { %3069 = shalt.err (!%p3066_p7)
}
 0x1c2   :  { %s3883_s23 = sld [smem:[#allocation78_spill]] }
 0x1c3   :  { %241 = dma.hbm_to_vmem [thread:$0]  %s3882_s3, 256, %s236_s18, [#allocation21], %s3381_s7, %s3381_s7, %s3382_s10  }
 0x1c8   :  { %s3070_s9 = scalar_lea.hbm %s3883_s23, 512 }
 0x1c9   :  { %p3071_p8 = scmp.ne.s32.totalorder %s3883_s23, %s3070_s9  ;;  %p3074_p9 = scmp.lt.u32.totalorder %s3070_s9, %s3883_s23 }
 0x1cb   :  { %p3076_p10 = pnand %p3074_p9, %p3071_p8 }
 0x1cd   :  { %3079 = shalt.err (!%p3076_p10)
}
 0x1ce   :  { %s3080_s14 = scalar_lea.vmem %s260_s13, 512  ;;  %p3085_p12 = scmp.lt.s32.totalorder %s260_s13, %s260_s13 }
 0x1cf   :  { %p3081_p11 = scmp.ne.s32.totalorder %s260_s13, %s3080_s14  ;;  %p3086_p13 = scmp.lt.s32.totalorder %s3080_s14, %s3080_s14 }
 0x1d1   :  { %p3087_p0 = por %p3086_p13, %p3085_p12 }
 0x1d3   :  { %p3088_p1 = pnand %p3087_p0, %p3081_p11 }
 0x1d5   :  { %3091 = shalt.err (!%p3088_p1)
}
 0x1d6   :  { %s3884_s26 = sld [smem:[#allocation79_spill]]  ;;  %s3405_s24 = smov [#allocation28]  }
 0x1d7   :  { %265 = dma.hbm_to_vmem [thread:$0]  %s3883_s23, 512, %s260_s13, [#allocation24], %s3381_s7, %s3381_s7, %s3382_s10  }
 0x1d8   :  { %s283_s19 = sshll.u32 %s3405_s24, 4  ;;  %s3406_s17 = smov [#allocation31]   ;;  %s284_s19 = int_to_ptr.vmem [resolvable:$true] %s283_s19 }
 0x1d9   :  { %s307_s8 = sshll.u32 %s3406_s17, 4  ;;  %s308_s8 = int_to_ptr.vmem [resolvable:$true] %s307_s8 }
 0x1dc   :  { %s3092_s0 = scalar_lea.hbm %s3884_s26, 512 }
 0x1dd   :  { %p3093_p2 = scmp.ne.s32.totalorder %s3884_s26, %s3092_s0  ;;  %p3096_p3 = scmp.lt.u32.totalorder %s3092_s0, %s3884_s26 }
 0x1df   :  { %p3098_p4 = pnand %p3096_p3, %p3093_p2 }
 0x1e1   :  { %3101 = shalt.err (!%p3098_p4)
}
 0x1e2   :  { %s3102_s28 = scalar_lea.vmem %s284_s19, 512  ;;  %p3107_p6 = scmp.lt.s32.totalorder %s284_s19, %s284_s19 }
 0x1e3   :  { %p3103_p5 = scmp.ne.s32.totalorder %s284_s19, %s3102_s28  ;;  %p3108_p7 = scmp.lt.s32.totalorder %s3102_s28, %s3102_s28 }
 0x1e5   :  { %p3109_p8 = por %p3108_p7, %p3107_p6 }
 0x1e7   :  { %p3110_p9 = pnand %p3109_p8, %p3103_p5 }
 0x1e9   :  { %3113 = shalt.err (!%p3110_p9)
}
 0x1ea   :  { %s3885_s1 = sld [smem:[#allocation80_spill]] }
 0x1eb   :  { %289 = dma.hbm_to_vmem [thread:$0]  %s3884_s26, 512, %s284_s19, [#allocation27], %s3381_s7, %s3381_s7, %s3382_s10  }
 0x1f0   :  { %s3114_s2 = scalar_lea.hbm %s3885_s1, 512 }
 0x1f1   :  { %p3115_p10 = scmp.ne.s32.totalorder %s3885_s1, %s3114_s2  ;;  %p3118_p11 = scmp.lt.u32.totalorder %s3114_s2, %s3885_s1 }
 0x1f3   :  { %p3120_p12 = pnand %p3118_p11, %p3115_p10 }
 0x1f5   :  { %3123 = shalt.err (!%p3120_p12)
}
 0x1f6   :  { %s3124_s6 = scalar_lea.vmem %s308_s8, 512  ;;  %p3129_p0 = scmp.lt.s32.totalorder %s308_s8, %s308_s8 }
 0x1f7   :  { %p3125_p13 = scmp.ne.s32.totalorder %s308_s8, %s3124_s6  ;;  %p3130_p1 = scmp.lt.s32.totalorder %s3124_s6, %s3124_s6 }
 0x1f9   :  { %p3131_p2 = por %p3130_p1, %p3129_p0 }
 0x1fb   :  { %p3132_p3 = pnand %p3131_p2, %p3125_p13 }
 0x1fd   :  { %3135 = shalt.err (!%p3132_p3)
}
 0x1fe   :  { %s3886_s29 = sld [smem:[#allocation81_spill]]  ;;  %s3407_s11 = smov [#allocation34]  }
 0x1ff   :  { %313 = dma.hbm_to_vmem [thread:$0]  %s3885_s1, 512, %s308_s8, [#allocation30], %s3381_s7, %s3381_s7, %s3382_s10  }
 0x200   :  { %s331_s20 = sshll.u32 %s3407_s11, 4  ;;  %s3408_s25 = smov [#allocation37]   ;;  %s332_s20 = int_to_ptr.vmem [resolvable:$true] %s331_s20 }
 0x201   :  { %s355_s21 = sshll.u32 %s3408_s25, 4  ;;  %s356_s21 = int_to_ptr.vmem [resolvable:$true] %s355_s21 }
 0x204   :  { %s3136_s15 = scalar_lea.hbm %s3886_s29, 512 }
 0x205   :  { %p3137_p4 = scmp.ne.s32.totalorder %s3886_s29, %s3136_s15  ;;  %p3140_p5 = scmp.lt.u32.totalorder %s3136_s15, %s3886_s29 }
 0x207   :  { %p3142_p6 = pnand %p3140_p5, %p3137_p4 }
 0x209   :  { %3145 = shalt.err (!%p3142_p6)
}
 0x20a   :  { %s3146_s3 = scalar_lea.vmem %s332_s20, 512  ;;  %p3151_p8 = scmp.lt.s32.totalorder %s332_s20, %s332_s20 }
 0x20b   :  { %p3147_p7 = scmp.ne.s32.totalorder %s332_s20, %s3146_s3  ;;  %p3152_p9 = scmp.lt.s32.totalorder %s3146_s3, %s3146_s3 }
 0x20d   :  { %p3153_p10 = por %p3152_p9, %p3151_p8 }
 0x20f   :  { %p3154_p11 = pnand %p3153_p10, %p3147_p7 }
 0x211   :  { %3157 = shalt.err (!%p3154_p11)
}
 0x212   :  { %s3887_s16 = sld [smem:[#allocation82_spill]] }
 0x213   :  { %337 = dma.hbm_to_vmem [thread:$0]  %s3886_s29, 512, %s332_s20, [#allocation33], %s3381_s7, %s3381_s7, %s3382_s10  }
 0x218   :  { %s3158_s18 = scalar_lea.hbm %s3887_s16, 256 }
 0x219   :  { %p3159_p12 = scmp.ne.s32.totalorder %s3887_s16, %s3158_s18  ;;  %p3162_p13 = scmp.lt.u32.totalorder %s3158_s18, %s3887_s16 }
 0x21b   :  { %p3164_p0 = pnand %p3162_p13, %p3159_p12 }
 0x21d   :  { %3167 = shalt.err (!%p3164_p0)
}
 0x21e   :  { %s3168_s4 = scalar_lea.vmem %s356_s21, 256  ;;  %p3173_p2 = scmp.lt.s32.totalorder %s356_s21, %s356_s21 }
 0x21f   :  { %p3169_p1 = scmp.ne.s32.totalorder %s356_s21, %s3168_s4  ;;  %p3174_p3 = scmp.lt.s32.totalorder %s3168_s4, %s3168_s4 }
 0x221   :  { %p3175_p4 = por %p3174_p3, %p3173_p2 }
 0x223   :  { %p3176_p5 = pnand %p3175_p4, %p3169_p1 }
 0x225   :  { %3179 = shalt.err (!%p3176_p5)
}
 0x226   :  { %s3888_s13 = sld [smem:[#allocation83_spill]]  ;;  %s3409_s22 = smov [#allocation40]  }
 0x227   :  { %361 = dma.hbm_to_vmem [thread:$0]  %s3887_s16, 256, %s356_s21, [#allocation36], %s3381_s7, %s3381_s7, %s3382_s10  }
 0x228   :  { %s379_s30 = sshll.u32 %s3409_s22, 4  ;;  %s3410_s23 = smov [#allocation43]   ;;  %s380_s30 = int_to_ptr.vmem [resolvable:$true] %s379_s30 }
 0x229   :  { %s404_s9 = sshll.u32 %s3410_s23, 4  ;;  %s405_s9 = int_to_ptr.vmem [resolvable:$true] %s404_s9 }
 0x22c   :  { %s3180_s14 = scalar_lea.hbm %s3888_s13, 256 }
 0x22d   :  { %p3181_p6 = scmp.ne.s32.totalorder %s3888_s13, %s3180_s14  ;;  %p3184_p7 = scmp.lt.u32.totalorder %s3180_s14, %s3888_s13 }
 0x22f   :  { %p3186_p8 = pnand %p3184_p7, %p3181_p6 }
 0x231   :  { %3189 = shalt.err (!%p3186_p8)
}
 0x232   :  { %s3190_s26 = scalar_lea.vmem %s380_s30, 256  ;;  %p3195_p10 = scmp.lt.s32.totalorder %s380_s30, %s380_s30 }
 0x233   :  { %p3191_p9 = scmp.ne.s32.totalorder %s380_s30, %s3190_s26  ;;  %p3196_p11 = scmp.lt.s32.totalorder %s3190_s26, %s3190_s26 }
 0x235   :  { %p3197_p12 = por %p3196_p11, %p3195_p10 }
 0x237   :  { %p3198_p13 = pnand %p3197_p12, %p3191_p9 }
 0x239   :  { %3201 = shalt.err (!%p3198_p13)
}
 0x23a   :  { %s3889_s24 = sld [smem:[#allocation84_spill]] }
 0x23b   :  { %385 = dma.hbm_to_vmem [thread:$0]  %s3888_s13, 256, %s380_s30, [#allocation39], %s3381_s7, %s3381_s7, %s3382_s10  }
 0x240   :  { %s3202_s19 = scalar_lea.hbm %s3889_s24, 64 }
 0x241   :  { %p3203_p0 = scmp.ne.s32.totalorder %s3889_s24, %s3202_s19  ;;  %p3206_p1 = scmp.lt.u32.totalorder %s3202_s19, %s3889_s24 }
 0x243   :  { %p3208_p2 = pnand %p3206_p1, %p3203_p0 }
 0x245   :  { %3211 = shalt.err (!%p3208_p2)
}
 0x246   :  { %s3212_s17 = scalar_lea.vmem %s405_s9, 64  ;;  %p3217_p4 = scmp.lt.s32.totalorder %s405_s9, %s405_s9 }
 0x247   :  { %p3213_p3 = scmp.ne.s32.totalorder %s405_s9, %s3212_s17  ;;  %p3218_p5 = scmp.lt.s32.totalorder %s3212_s17, %s3212_s17 }
 0x249   :  { %p3219_p6 = por %p3218_p5, %p3217_p4 }
 0x24b   :  { %p3220_p7 = pnand %p3219_p6, %p3213_p3 }
 0x24d   :  { %3223 = shalt.err (!%p3220_p7)
}
 0x24e   :  { %s3890_s8 = sld [smem:[#allocation85_spill]]  ;;  %s3411_s0 = smov [#allocation46]  }
 0x24f   :  { %407 = dma.hbm_to_vmem [thread:$0]  %s3889_s24, 64, %s405_s9, [#allocation42]  }
 0x250   :  { %s424_s7 = sshll.u32 %s3411_s0, 4  ;;  %s3412_s10 = smov [#allocation49]   ;;  %s425_s7 = int_to_ptr.vmem [resolvable:$true] %s424_s7 }
 0x251   :  { %s444_s28 = sshll.u32 %s3412_s10, 4  ;;  %s445_s28 = int_to_ptr.vmem [resolvable:$true] %s444_s28 }
 0x254   :  { %s3224_s1 = scalar_lea.hbm %s3890_s8, 64 }
 0x255   :  { %p3225_p8 = scmp.ne.s32.totalorder %s3890_s8, %s3224_s1  ;;  %p3228_p9 = scmp.lt.u32.totalorder %s3224_s1, %s3890_s8 }
 0x257   :  { %p3230_p10 = pnand %p3228_p9, %p3225_p8 }
 0x259   :  { %3233 = shalt.err (!%p3230_p10)
}
 0x25a   :  { %s3234_s2 = scalar_lea.vmem %s425_s7, 64  ;;  %p3239_p12 = scmp.lt.s32.totalorder %s425_s7, %s425_s7 }
 0x25b   :  { %p3235_p11 = scmp.ne.s32.totalorder %s425_s7, %s3234_s2  ;;  %p3240_p13 = scmp.lt.s32.totalorder %s3234_s2, %s3234_s2 }
 0x25d   :  { %p3241_p0 = por %p3240_p13, %p3239_p12 }
 0x25f   :  { %p3242_p1 = pnand %p3241_p0, %p3235_p11 }
 0x261   :  { %3245 = shalt.err (!%p3242_p1)
}
 0x262   :  { %427 = dma.hbm_to_vmem [thread:$0]  %s3890_s8, 64, %s425_s7, [#allocation45]  }
 0x263   :  { %s3246_s6 = scalar_lea.hbm %s3587_s12, 128 }
 0x264   :  { %p3247_p2 = scmp.ne.s32.totalorder %s3587_s12, %s3246_s6  ;;  %p3250_p3 = scmp.lt.u32.totalorder %s3246_s6, %s3587_s12 }
 0x266   :  { %p3252_p4 = pnand %p3250_p3, %p3247_p2 }
 0x268   :  { %3255 = shalt.err (!%p3252_p4)
}
 0x269   :  { %s3256_s29 = scalar_lea.vmem %s445_s28, 128  ;;  %p3261_p6 = scmp.lt.s32.totalorder %s445_s28, %s445_s28 }
 0x26a   :  { %p3257_p5 = scmp.ne.s32.totalorder %s445_s28, %s3256_s29  ;;  %p3262_p7 = scmp.lt.s32.totalorder %s3256_s29, %s3256_s29 }
 0x26c   :  { %p3263_p8 = por %p3262_p7, %p3261_p6 }
 0x26e   :  { %p3264_p9 = pnand %p3263_p8, %p3257_p5 }
 0x270   :  { %3267 = shalt.err (!%p3264_p9)
}
 0x271   :  { %447 = dma.hbm_to_vmem [thread:$0]  %s3587_s12, 128, %s445_s28, [#allocation48]  }
 0x272   :  { %s3413_s11 = smov [#allocation50]   ;;  %s3268_s25 = scalar_lea.hbm %s3592_s5, 128 }
 0x273   :  { %s454_s20 = sshll.u32 %s3413_s11, 4  ;;  %p3269_p10 = scmp.ne.s32.totalorder %s3592_s5, %s3268_s25  ;;  %s455_s20 = int_to_ptr.vmem [resolvable:$true] %s454_s20 }
 0x274   :  { %p3272_p11 = scmp.lt.u32.totalorder %s3268_s25, %s3592_s5 }
 0x276   :  { %p3274_p12 = pnand %p3272_p11, %p3269_p10 }
 0x278   :  { %3277 = shalt.err (!%p3274_p12)
}
 0x279   :  { %s3278_s21 = scalar_lea.vmem %s455_s20, 128  ;;  %p3283_p0 = scmp.lt.s32.totalorder %s455_s20, %s455_s20 }
 0x27a   :  { %p3279_p13 = scmp.ne.s32.totalorder %s455_s20, %s3278_s21  ;;  %p3284_p1 = scmp.lt.s32.totalorder %s3278_s21, %s3278_s21 }
 0x27c   :  { %p3285_p2 = por %p3284_p1, %p3283_p0 }
 0x27e   :  { %p3286_p3 = pnand %p3285_p2, %p3279_p13 }
 0x280   :  { %3289 = shalt.err (!%p3286_p3)
}
 0x281   :  { %457 = dma.hbm_to_vmem [thread:$0]  %s3592_s5, 128, %s455_s20, [#allocation51]  }
 0x282   :  { %3312 = dma.done.wait [#allocation3], 128  }
 0x283   :  { %3313 = vsyncadd [#allocation3], 4294967168 }
 0x284   :  { %3314 = dma.done.wait [#allocation6], 1152  }
 0x285   :  { %3315 = vsyncadd [#allocation6], 4294966144 }
 0x286   :  { %3316 = dma.done.wait [#allocation9], 512  }
 0x287   :  { %3317 = vsyncadd [#allocation9], 4294966784 }
 0x288   :  { %3318 = dma.done.wait [#allocation12], 512  }
 0x289   :  { %3319 = vsyncadd [#allocation12], 4294966784 }
 0x28a   :  { %3320 = dma.done.wait [#allocation15], 512  }
 0x28b   :  { %3321 = vsyncadd [#allocation15], 4294966784 }
 0x28c   :  { %3322 = dma.done.wait [#allocation18], 512  }
 0x28d   :  { %3323 = vsyncadd [#allocation18], 4294966784 }
 0x28e   :  { %3324 = dma.done.wait [#allocation21], 512  }
 0x28f   :  { %3325 = vsyncadd [#allocation21], 4294966784 }
 0x290   :  { %3326 = dma.done.wait [#allocation24], 768  }
 0x291   :  { %3327 = vsyncadd [#allocation24], 4294966528 }
 0x292   :  { %3328 = dma.done.wait [#allocation27], 1024  }
 0x293   :  { %3329 = vsyncadd [#allocation27], 4294966272 }
 0x294   :  { %3330 = dma.done.wait [#allocation30], 1024  }
 0x295   :  { %3331 = vsyncadd [#allocation30], 4294966272 }
 0x296   :  { %3332 = dma.done.wait [#allocation33], 1024  }
 0x297   :  { %3333 = vsyncadd [#allocation33], 4294966272 }
 0x298   :  { %3334 = dma.done.wait [#allocation36], 768  }
 0x299   :  { %3335 = vsyncadd [#allocation36], 4294966528 }
 0x29a   :  { %3336 = dma.done.wait [#allocation39], 512  }
 0x29b   :  { %3337 = vsyncadd [#allocation39], 4294966784 }
 0x29c   :  { %3338 = dma.done.wait [#allocation42], 320  }
 0x29d   :  { %3339 = vsyncadd [#allocation42], 4294966976 }
 0x29e   :  { %3340 = dma.done.wait [#allocation45], 128  }
 0x29f   :  { %3341 = vsyncadd [#allocation45], 4294967168 }
 0x2a0   :  { %3342 = dma.done.wait [#allocation48], 192  }
 0x2a1   :  { %3343 = vsyncadd [#allocation48], 4294967104 }
 0x2a2   :  { %3344 = dma.done.wait [#allocation51], 128  }
 0x2a3   :  { %3345 = vsyncadd [#allocation51], 4294967168  ;;  %vm586_vm0 = vcmask 326656   ;;  %v554_v0 = vld [vmem:[#allocation2] sm:$0xff]  ;;  %s3414_s5 = smov 127   ;;  %s3415_s12 = smov 125  }
 0x2a4   :  { %v555_v1 = vld [vmem:[#allocation7] sm:$0xff]  ;;  %564 = vrot.lane.b32.xlu0 %v554_v0, %s3414_s5  ;;  %570 = vrot.lane.b32.xlu1 %v554_v0, %s3415_s12  ;;  %v3416_v2 = vmov 0   ;;  %s3417_s15 = smov 126   ;;  %s3418_s3 = smov 124   ;;  %v558_v3 = vld [vmem:[#allocation8 + $0x8] sm:$0xff]  ;;  %v557_v4 = vld [vmem:[#allocation8] sm:$0xff] }
 0x2a5   :  { %2165 = vmatprep.mubr.msk.f32.mxu0 %vm586_vm0, %v555_v1  ;;  %2518 = vset.pattern.permute.xlu1 %v3416_v2  ;;  %v559_v5 = vld [vmem:[#allocation10] sm:$0xff]  ;;  %v560_v6 = vld [vmem:[#allocation10 + $0x8] sm:$0xff]  ;;  %v561_v7 = vld [vmem:[#allocation11] sm:$0xff]  ;;  %s3419_s16 = smov 120   ;;  %s3420_s18 = smov 122   ;;  %vm738_vm1 = vcmask 654336  }
 0x2a6   :  { %2517 = vset.pattern.permute.xlu0 %v3416_v2  ;;  %v562_v8 = vld [vmem:[#allocation11 + $0x8] sm:$0xff]  ;;  %v556_v15 = vld [vmem:[#allocation7 + $0x8] sm:$0xff]  ;;  %v694_v34 = vld [vmem:[#allocation13] sm:$0xff]  ;;  %s3421_s4 = smov 116   ;;  %s3422_s13 = smov 119   ;;  %vm902_vm2 = vcmask 916480  }
 0x2a7   :  { %v697_v35 = vld [vmem:[#allocation14 + $0x8] sm:$0xff]  ;;  %v696_v36 = vld [vmem:[#allocation14] sm:$0xff]  ;;  %2188 = vmatprep.mubr.msk.f32.mxu1 %vm738_vm1, %v694_v34  ;;  %v699_v37 = vld [vmem:[#allocation16 + $0x8] sm:$0xff]  ;;  %s3423_s22 = smov 110   ;;  %s3424_s30 = smov 113   ;;  %vm1054_vm3 = vcmask 261120  }
 0x2a8   :  { %567 = vrot.lane.b32.xlu0 %v554_v0, %s3417_s15  ;;  %573 = vrot.lane.b32.xlu1 %v554_v0, %s3418_s3  ;;  %v698_v38 = vld [vmem:[#allocation16] sm:$0xff]  ;;  %v701_v39 = vld [vmem:[#allocation17 + $0x8] sm:$0xff]  ;;  %v700_v40 = vld [vmem:[#allocation17] sm:$0xff]  ;;  %vm1409_vm4 = vcmask 1040384   ;;  %vm1396_vm5 = vcmask 400384   ;;  %vm1661_vm6 = vcmask 523264  }
 0x2a9   :  { %v695_v57 = vld [vmem:[#allocation13 + $0x8] sm:$0xff]  ;;  %v1774_v34 = vld [vmem:[#allocation44] sm:$0xf]  ;;  %vm3426_vm15 = vmmov 0   ;;  %s3428_s23 = smov [#allocation52]  }
 0x2aa   :  { %s1981_s9 = sshll.u32 %s3428_s23, 4  ;;  %s1982_s9 = int_to_ptr.vmem [resolvable:$true] %s1981_s9 }
 0x2ab   :  { %s3290_s14 = scalar_lea.vmem %s1982_s9, 128  ;;  %p3295_p5 = scmp.lt.s32.totalorder %s1982_s9, %s1982_s9 }
 0x2ac   :  { %583 = vperm.xlu1 %2518, %v558_v3   ;;  %578 = vperm.xlu0 %2517, %v557_v4   ;;  %p3291_p4 = scmp.ne.s32.totalorder %s1982_s9, %s3290_s14  ;;  %p3296_p6 = scmp.lt.s32.totalorder %s3290_s14, %s3290_s14 }
 0x2ae   :  { %p3297_p7 = por %p3296_p6, %p3295_p5 }
 0x2b0   :  { %672 = vperm.xlu1 %2518, %v559_v5   ;;  %677 = vperm.xlu0 %2517, %v560_v6   ;;  %p3298_p8 = pnand %p3297_p7, %p3291_p4 }
 0x2b4   :  { %684 = vperm.xlu1 %2518, %v561_v7   ;;  %689 = vperm.xlu0 %2517, %v562_v8  }
 0x316   :  { %v565_v9 = vpop.permute.xlu0 %564  ;;  %v571_v11 = vpop.permute.xlu1 %570 }
 0x317   :  { %v2321_v10 = vpack.c.bf16 %v565_v9, %v554_v0 }
 0x319   :  { %2322 = vmatprep.subr.bf16.mxu0 %v2321_v10 }
 0x31a   :  { %2324 = vmatpush3.bf16.msra.mxu0 %v2321_v10  ;;  %v568_v12 = vpop.permute.xlu0 %567  ;;  %v574_v14 = vpop.permute.xlu1 %573 }
 0x31b   :  { %v2325_v13 = vpack.c.bf16 %v571_v11, %v568_v12  ;;  %v849_v12 = vld [vmem:[#allocation20 + $0x8] sm:$0xff] }
 0x31d   :  { %2326 = vmatprep.subr.bf16.mxu0 %v2325_v13 }
 0x31e   :  { %2328 = vmatpush3.bf16.msra.mxu0 %v2325_v13  ;;  %v848_v13 = vld [vmem:[#allocation20] sm:$0xff] }
 0x31f   :  { %2163 = vmatprep.subr.mxu0 %v574_v14 }
 0x322   :  { %2164 = vmatpush3.msra.mxu0 %v574_v14  ;;  %v846_v14 = vld [vmem:[#allocation19] sm:$0xff] }
 0x323   :  { %2166 = vmatmul.mubr.msk.f32.vlgmr.msra.gmra.mrb[0].mxu0 %vm586_vm0, %v556_v15  ;;  %v851_v15 = vld [vmem:[#allocation22 + $0x8] sm:$0xff]  ;;  %vm1780_vm0 = vcmask 130048  }
 0x324   :  { %2219 = vmatprep.mubr.msk.f32.mxu0 %vm902_vm2, %v846_v14 }
 0x32b   :  { %v579_v16 = vpop.permute.xlu0 %578  ;;  %v584_v17 = vpop.permute.xlu1 %583 }
 0x32f   :  { %v678_v18 = vpop.permute.xlu0 %677  ;;  %v673_v20 = vpop.permute.xlu1 %672 }
 0x333   :  { %v690_v27 = vpop.permute.xlu0 %689  ;;  %v685_v29 = vpop.permute.xlu1 %684 }
 0x3f6   :  { %v2167_v19 = vpop.f32.mrb[0].mxu0 }
 0x3f7   :  { %v665_v21 = vadd.f32 %v2167_v19, %v584_v17  ;;  %v659_v22 = vpop.f32.mrb[1].mxu0  ;;  %v853_v17 = vld [vmem:[#allocation23 + $0x8] sm:$0xff]  ;;  %v1014_v19 = vld [vmem:[#allocation26] sm:$0xff] }
 0x3f8   :  { %v660_v23 = vadd.f32 %v659_v22, %v579_v16  ;;  %v850_v16 = vld [vmem:[#allocation22] sm:$0xff] }
 0x3f9   :  { %v669_v24 = vmax.f32 %v665_v21, 0.0  ;;  %v1018_v21 = vld [vmem:[#allocation28] sm:$0xff] }
 0x3fa   :  { %v668_v25 = vmax.f32 %v660_v23, 0.0  ;;  %v1022_v22 = vld [vmem:[#allocation29] sm:$0xff]  ;;  %v1020_v23 = vld [vmem:[#allocation28 + $0x10] sm:$0xff] }
 0x3fb   :  { %v681_v26 = vmul.f32 %v678_v18, %v669_v24  ;;  %v852_v18 = vld [vmem:[#allocation23] sm:$0xff] }
 0x3fc   :  { %v680_v28 = vmul.f32 %v673_v20, %v668_v25  ;;  %v1016_v20 = vld [vmem:[#allocation26 + $0x10] sm:$0xff]  ;;  %v1208_v25 = vld [vmem:[#allocation32] sm:$0xff] }
 0x3fd   :  { %v693_v30 = vadd.f32 %v690_v27, %v681_v26  ;;  %v1024_v24 = vld [vmem:[#allocation29 + $0x10] sm:$0xff]  ;;  %v1211_v27 = vld [vmem:[#allocation32 + $0x18] sm:$0xff] }
 0x3fe   :  { %v692_v31 = vadd.f32 %v685_v29, %v680_v28  ;;  %v1210_v26 = vld [vmem:[#allocation32 + $0x10] sm:$0xff]  ;;  %v1216_v28 = vld [vmem:[#allocation35] sm:$0xff] }
 0x3ff   :  { %v1214_v29 = vld [vmem:[#allocation34 + $0x10] sm:$0xff] }
 0x400   :  { %v2524_v32 = vpack.i.bf16 %v693_v30, %v692_v31  ;;  %v2329_v33 = vpack.c.bf16 %v693_v30, %v692_v31  ;;  %v1218_v30 = vld [vmem:[#allocation35 + $0x10] sm:$0xff] }
 0x401   :  { %v1649_v31 = vld [vmem:[#allocation38] sm:$0xff] }
 0x402   :  { %2525 = vrot.lane.b32.xlu0 %v2524_v32, %s3418_s3  ;;  %2520 = vrot.lane.b32.xlu1 %v2524_v32, %s3417_s15 }
 0x403   :  { %2330 = vmatprep.subr.bf16.mxu1 %v2329_v33 }
 0x404   :  { %2332 = vmatpush3.bf16.msra.mxu1 %v2329_v33  ;;  %v1759_v33 = vld [vmem:[#allocation41] sm:$0xff] }
 0x406   :  { %2535 = vrot.lane.b32.xlu0 %v2524_v32, %s3419_s16  ;;  %2530 = vrot.lane.b32.xlu1 %v2524_v32, %s3420_s18  ;;  %v1745_v32 = vld [vmem:[#allocation40] sm:$0xff] }
 0x40a   :  { %735 = vperm.xlu0 %2517, %v697_v35   ;;  %730 = vperm.xlu1 %2518, %v696_v36   ;;  %v1862_v35 = vld [vmem:[#allocation47] sm:$0xf] }
 0x40e   :  { %829 = vperm.xlu0 %2517, %v699_v37   ;;  %824 = vperm.xlu1 %2518, %v698_v38  }
 0x412   :  { %841 = vperm.xlu0 %2517, %v701_v39   ;;  %836 = vperm.xlu1 %2518, %v700_v40  }
 0x474   :  { %v2526_v41 = vpop.permute.xlu0 %2525  ;;  %v2521_v42 = vpop.permute.xlu1 %2520 }
 0x475   :  { %v2528_v43 = vunpack.i.h.bf16 %v2526_v41  ;;  %v2527_v44 = vunpack.i.l.bf16 %v2526_v41  ;;  %v2523_v45 = vunpack.i.h.bf16 %v2521_v42  ;;  %v2522_v46 = vunpack.i.l.bf16 %v2521_v42 }
 0x477   :  { %v2333_v47 = vpack.c.bf16 %v2523_v45, %v2522_v46  ;;  %v2337_v49 = vpack.c.bf16 %v2528_v43, %v2527_v44 }
 0x478   :  { %v2531_v48 = vpop.permute.xlu1 %2530  ;;  %v2536_v52 = vpop.permute.xlu0 %2535 }
 0x479   :  { %v2533_v50 = vunpack.i.h.bf16 %v2531_v48  ;;  %v2532_v51 = vunpack.i.l.bf16 %v2531_v48  ;;  %2334 = vmatprep.subr.bf16.mxu1 %v2333_v47  ;;  %v2538_v53 = vunpack.i.h.bf16 %v2536_v52  ;;  %v2537_v54 = vunpack.i.l.bf16 %v2536_v52 }
 0x47a   :  { %2336 = vmatpush3.bf16.msra.mxu1 %v2333_v47 }
 0x47b   :  { %2338 = vmatprep.subr.bf16.mxu1 %v2337_v49  ;;  %v2341_v55 = vpack.c.bf16 %v2533_v50, %v2532_v51  ;;  %v2345_v56 = vpack.c.bf16 %v2538_v53, %v2537_v54 }
 0x47e   :  { %2340 = vmatpush3.bf16.msra.mxu1 %v2337_v49 }
 0x47f   :  { %2342 = vmatprep.subr.bf16.mxu1 %v2341_v55 }
 0x482   :  { %2344 = vmatpush3.bf16.msra.mxu1 %v2341_v55 }
 0x483   :  { %2346 = vmatprep.subr.bf16.mxu1 %v2345_v56 }
 0x486   :  { %2348 = vmatpush3.bf16.msra.mxu1 %v2345_v56 }
 0x489   :  { %2189 = vmatmul.mubr.msk.f32.vlgmr.msra.gmra.mrb[0].mxu1 %vm738_vm1, %v695_v57  ;;  %v736_v58 = vpop.permute.xlu0 %735  ;;  %v731_v59 = vpop.permute.xlu1 %730  ;;  %vm1880_vm1 = vcmask 1043456  }
 0x48d   :  { %v830_v60 = vpop.permute.xlu0 %829  ;;  %v825_v62 = vpop.permute.xlu1 %824 }
 0x491   :  { %v842_v5 = vpop.permute.xlu0 %841  ;;  %v837_v7 = vpop.permute.xlu1 %836 }
 0x55c   :  { %v2190_v61 = vpop.f32.mrb[0].mxu1 }
 0x55d   :  { %v817_v63 = vadd.f32 %v2190_v61, %v736_v58  ;;  %v811_v0 = vpop.f32.mrb[1].mxu1 }
 0x55e   :  { %v812_v1 = vadd.f32 %v811_v0, %v731_v59 }
 0x55f   :  { %v821_v2 = vmax.f32 %v817_v63, 0.0 }
 0x560   :  { %v820_v3 = vmax.f32 %v812_v1, 0.0 }
 0x561   :  { %v833_v4 = vmul.f32 %v830_v60, %v821_v2  ;;  %v847_v60 = vld [vmem:[#allocation19 + $0x8] sm:$0xff] }
 0x562   :  { %v832_v6 = vmul.f32 %v825_v62, %v820_v3 }
 0x563   :  { %v845_v8 = vadd.f32 %v842_v5, %v833_v4 }
 0x564   :  { %v844_v9 = vadd.f32 %v837_v7, %v832_v6  ;;  %v1010_v7 = vld [vmem:[#allocation25] sm:$0xff] }
 0x565   :  { %2230 = vmatprep.mubr.msk.f32.mxu1 %vm1054_vm3, %v1010_v7 }
 0x566   :  { %v2544_v10 = vpack.i.bf16 %v845_v8, %v844_v9  ;;  %v2349_v11 = vpack.c.bf16 %v845_v8, %v844_v9 }
 0x568   :  { %2545 = vrot.lane.b32.xlu0 %v2544_v10, %s3420_s18  ;;  %2540 = vrot.lane.b32.xlu1 %v2544_v10, %s3415_s12 }
 0x569   :  { %2350 = vmatprep.subr.bf16.mxu0 %v2349_v11 }
 0x56a   :  { %2352 = vmatpush3.bf16.msra.mxu0 %v2349_v11 }
 0x56c   :  { %2555 = vrot.lane.b32.xlu0 %v2544_v10, %s3421_s4  ;;  %2550 = vrot.lane.b32.xlu1 %v2544_v10, %s3422_s13 }
 0x570   :  { %2565 = vrot.lane.b32.xlu0 %v2544_v10, %s3423_s22  ;;  %2560 = vrot.lane.b32.xlu1 %v2544_v10, %s3424_s30 }
 0x574   :  { %899 = vperm.xlu0 %2517, %v849_v12   ;;  %894 = vperm.xlu1 %2518, %v848_v13  }
 0x578   :  { %993 = vperm.xlu0 %2517, %v851_v15   ;;  %988 = vperm.xlu1 %2518, %v850_v16   ;;  %v1015_v16 = vld [vmem:[#allocation26 + $0x8] sm:$0xff] }
 0x57c   :  { %1005 = vperm.xlu0 %2517, %v853_v17   ;;  %1000 = vperm.xlu1 %2518, %v852_v18   ;;  %v1017_v17 = vld [vmem:[#allocation26 + $0x18] sm:$0xff]  ;;  %v1019_v18 = vld [vmem:[#allocation28 + $0x8] sm:$0xff] }
 0x580   :  { %1036 = vperm.xlu0 %2517, %v1014_v19   ;;  %v1023_v19 = vld [vmem:[#allocation29 + $0x8] sm:$0xff] }
 0x584   :  { %1046 = vperm.xlu0 %2517, %v1016_v20   ;;  %v1021_v20 = vld [vmem:[#allocation28 + $0x18] sm:$0xff] }
 0x588   :  { %1158 = vperm.xlu0 %2517, %v1018_v21   ;;  %v1025_v21 = vld [vmem:[#allocation29 + $0x18] sm:$0xff] }
 0x58c   :  { %1182 = vperm.xlu0 %2517, %v1022_v22   ;;  %v1209_v22 = vld [vmem:[#allocation32 + $0x8] sm:$0xff] }
 0x590   :  { %1168 = vperm.xlu0 %2517, %v1020_v23   ;;  %v1212_v23 = vld [vmem:[#allocation34] sm:$0xff] }
 0x594   :  { %1192 = vperm.xlu0 %2517, %v1024_v24   ;;  %v1213_v24 = vld [vmem:[#allocation34 + $0x8] sm:$0xff] }
 0x598   :  { %1222 = vperm.xlu0 %2517, %v1208_v25   ;;  %v1217_v25 = vld [vmem:[#allocation35 + $0x8] sm:$0xff] }
 0x59c   :  { %1232 = vperm.xlu0 %2517, %v1210_v26   ;;  %v1215_v26 = vld [vmem:[#allocation34 + $0x18] sm:$0xff] }
 0x5a0   :  { %1237 = vperm.xlu0 %2517, %v1211_v27   ;;  %v1219_v27 = vld [vmem:[#allocation35 + $0x18] sm:$0xff] }
 0x5a4   :  { %1367 = vperm.xlu0 %2517, %v1216_v28   ;;  %v1650_v28 = vld [vmem:[#allocation38 + $0x8] sm:$0xff] }
 0x5a8   :  { %1353 = vperm.xlu0 %2517, %v1214_v29   ;;  %v1746_v29 = vld [vmem:[#allocation40 + $0x8] sm:$0xff] }
 0x5ac   :  { %1377 = vperm.xlu0 %2517, %v1218_v30   ;;  %v1760_v30 = vld [vmem:[#allocation41 + $0x8] sm:$0xff] }
 0x5b0   :  { %1653 = vperm.xlu0 %2517, %v1649_v31   ;;  %v1855_v31 = vld [vmem:[#allocation46] sm:$0xf] }
 0x5b4   :  { %1749 = vperm.xlu0 %2517, %v1745_v32   ;;  %v1870_v32 = vld [vmem:[#allocation50] sm:$0xff] }
 0x5b8   :  { %1763 = vperm.xlu0 %2517, %v1759_v33  }
 0x5bc   :  { %1777 = vperm.xlu0 %2517, %v1774_v34  }
 0x5c0   :  { %1865 = vperm.xlu0 %2517, %v1862_v35  }
 0x5da   :  { %v2546_v36 = vpop.permute.xlu0 %2545  ;;  %v2541_v37 = vpop.permute.xlu1 %2540 }
 0x5db   :  { %v2548_v38 = vunpack.i.h.bf16 %v2546_v36  ;;  %v2547_v39 = vunpack.i.l.bf16 %v2546_v36  ;;  %v2543_v40 = vunpack.i.h.bf16 %v2541_v37  ;;  %v2542_v41 = vunpack.i.l.bf16 %v2541_v37  ;;  %v1011_v37 = vld [vmem:[#allocation25 + $0x8] sm:$0xff] }
 0x5dd   :  { %v2353_v42 = vpack.c.bf16 %v2543_v40, %v2542_v41  ;;  %v2357_v44 = vpack.c.bf16 %v2548_v38, %v2547_v39  ;;  %v1012_v38 = vld [vmem:[#allocation25 + $0x10] sm:$0xff]  ;;  %v1013_v39 = vld [vmem:[#allocation25 + $0x18] sm:$0xff]  ;;  %v1204_v40 = vld [vmem:[#allocation31] sm:$0xff] }
 0x5de   :  { %v2551_v43 = vpop.permute.xlu1 %2550  ;;  %v2556_v47 = vpop.permute.xlu0 %2555  ;;  %v1389_v41 = vld [vmem:[#allocation5] sm:$0xff] }
 0x5df   :  { %v2553_v45 = vunpack.i.h.bf16 %v2551_v43  ;;  %v2552_v46 = vunpack.i.l.bf16 %v2551_v43  ;;  %2354 = vmatprep.subr.bf16.mxu0 %v2353_v42  ;;  %v2558_v48 = vunpack.i.h.bf16 %v2556_v47  ;;  %v2557_v49 = vunpack.i.l.bf16 %v2556_v47 }
 0x5e0   :  { %2356 = vmatpush3.bf16.msra.mxu0 %v2353_v42  ;;  %v1390_v42 = vld [vmem:[#allocation5 + $0x8] sm:$0xff] }
 0x5e1   :  { %2358 = vmatprep.subr.bf16.mxu0 %v2357_v44  ;;  %v2361_v50 = vpack.c.bf16 %v2553_v45, %v2552_v46  ;;  %v2365_v52 = vpack.c.bf16 %v2558_v48, %v2557_v49  ;;  %v2393_v43 = vpack.c.bf16 %v1390_v42, %v1389_v41 }
 0x5e2   :  { %v2561_v51 = vpop.permute.xlu1 %2560  ;;  %v2566_v55 = vpop.permute.xlu0 %2565 }
 0x5e3   :  { %v2563_v53 = vunpack.i.h.bf16 %v2561_v51  ;;  %v2562_v54 = vunpack.i.l.bf16 %v2561_v51  ;;  %v2568_v56 = vunpack.i.h.bf16 %v2566_v55  ;;  %v2567_v57 = vunpack.i.l.bf16 %v2566_v55 }
 0x5e4   :  { %2360 = vmatpush3.bf16.msra.mxu0 %v2357_v44 }
 0x5e5   :  { %2362 = vmatprep.subr.bf16.mxu0 %v2361_v50  ;;  %v2369_v58 = vpack.c.bf16 %v2563_v53, %v2562_v54  ;;  %v2373_v59 = vpack.c.bf16 %v2568_v56, %v2567_v57 }
 0x5e8   :  { %2364 = vmatpush3.bf16.msra.mxu0 %v2361_v50 }
 0x5e9   :  { %2366 = vmatprep.subr.bf16.mxu0 %v2365_v52 }
 0x5ec   :  { %2368 = vmatpush3.bf16.msra.mxu0 %v2365_v52 }
 0x5ed   :  { %2370 = vmatprep.subr.bf16.mxu0 %v2369_v58 }
 0x5f0   :  { %2372 = vmatpush3.bf16.msra.mxu0 %v2369_v58 }
 0x5f1   :  { %2374 = vmatprep.subr.bf16.mxu0 %v2373_v59 }
 0x5f3   :  { %v900_v61 = vpop.permute.xlu0 %899  ;;  %v895_v62 = vpop.permute.xlu1 %894 }
 0x5f4   :  { %2376 = vmatpush3.bf16.msra.mxu0 %v2373_v59 }
 0x5f5   :  { %2406 = vmatprep.subr.bf16.mxu0 %v2393_v43 }
 0x5f7   :  { %2220 = vmatmul.mubr.msk.f32.vlgmr.msra.gmra.mrb[2].mxu0 %vm902_vm2, %v847_v60  ;;  %v994_v63 = vpop.permute.xlu0 %993  ;;  %v989_v1 = vpop.permute.xlu1 %988  ;;  %vm1876_vm2 = vcmask 31744  }
 0x5f8   :  { %2408 = vmatpush3.bf16.msra.mxu0 %v2393_v43 }
 0x5fb   :  { %v1006_v9 = vpop.permute.xlu0 %1005  ;;  %v1001_v11 = vpop.permute.xlu1 %1000 }
 0x5ff   :  { %v1037_v45 = vpop.permute.xlu0 %1036 }
 0x603   :  { %v1047_v47 = vpop.permute.xlu0 %1046 }
 0x607   :  { %v1159_v49 = vpop.permute.xlu0 %1158 }
 0x60b   :  { %v1183_v51 = vpop.permute.xlu0 %1182 }
 0x60f   :  { %v1169_v60 = vpop.permute.xlu0 %1168 }
 0x6ca   :  { %v2221_v0 = vpop.f32.mrb[2].mxu0 }
 0x6cb   :  { %v981_v2 = vadd.f32 %v2221_v0, %v900_v61  ;;  %v975_v3 = vpop.f32.mrb[3].mxu0 }
 0x6cc   :  { %v976_v4 = vadd.f32 %v975_v3, %v895_v62 }
 0x6cd   :  { %v985_v5 = vmax.f32 %v981_v2, 0.0 }
 0x6ce   :  { %v984_v6 = vmax.f32 %v976_v4, 0.0 }
 0x6cf   :  { %v997_v8 = vmul.f32 %v994_v63, %v985_v5 }
 0x6d0   :  { %v996_v10 = vmul.f32 %v989_v1, %v984_v6 }
 0x6d1   :  { %v1009_v12 = vadd.f32 %v1006_v9, %v997_v8 }
 0x6d2   :  { %v1008_v13 = vadd.f32 %v1001_v11, %v996_v10  ;;  %v1193_v10 = vpop.permute.xlu0 %1192 }
 0x6d4   :  { %v2569_v14 = vpack.i.bf16 %v1009_v12, %v1008_v13  ;;  %v2377_v15 = vpack.c.bf16 %v1009_v12, %v1008_v13 }
 0x6d6   :  { %2570 = vrot.lane.b32.xlu1 %v2569_v14, %s3414_s5  ;;  %2378 = vmatprep.subr.bf16.mxu1 %v2377_v15  ;;  %v1205_v14 = vld [vmem:[#allocation31 + $0x8] sm:$0xff] }
 0x6d7   :  { %2380 = vmatpush3.bf16.msra.mxu1 %v2377_v15  ;;  %v1206_v15 = vld [vmem:[#allocation31 + $0x10] sm:$0xff] }
 0x6da   :  { %1041 = vperm.xlu1 %2518, %v1015_v16   ;;  %v1207_v16 = vld [vmem:[#allocation31 + $0x18] sm:$0xff] }
 0x6de   :  { %1051 = vperm.xlu1 %2518, %v1017_v17   ;;  %v1391_v17 = vld [vmem:[#allocation5 + $0x10] sm:$0xff] }
 0x6e2   :  { %1163 = vperm.xlu1 %2518, %v1019_v18   ;;  %v1392_v18 = vld [vmem:[#allocation5 + $0x18] sm:$0xff] }
 0x6e6   :  { %1187 = vperm.xlu1 %2518, %v1023_v19   ;;  %v2397_v19 = vpack.c.bf16 %v1392_v18, %v1391_v17 }
 0x6e8   :  { %2410 = vmatprep.subr.bf16.mxu0 %v2397_v19 }
 0x6e9   :  { %2412 = vmatpush3.bf16.msra.mxu0 %v2397_v19 }
 0x6ea   :  { %1173 = vperm.xlu1 %2518, %v1021_v20   ;;  %v1393_v20 = vld [vmem:[#allocation5 + $0x20] sm:$0xff] }
 0x6ee   :  { %1197 = vperm.xlu1 %2518, %v1025_v21   ;;  %v1394_v21 = vld [vmem:[#allocation5 + $0x28] sm:$0xff] }
 0x6f2   :  { %1227 = vperm.xlu1 %2518, %v1209_v22   ;;  %v2401_v22 = vpack.c.bf16 %v1394_v21, %v1393_v20 }
 0x6f4   :  { %2414 = vmatprep.subr.bf16.mxu0 %v2401_v22 }
 0x6f5   :  { %2416 = vmatpush3.bf16.msra.mxu0 %v2401_v22 }
 0x6f6   :  { %1343 = vperm.xlu1 %2518, %v1212_v23   ;;  %v1395_v23 = vld [vmem:[#allocation5 + $0x30] sm:$0x1] }
 0x6f7   :  { %2282 = vmatprep.subr.msk.mxu0 %vm1409_vm4, %v1395_v23 }
 0x6f9   :  { %2283 = vmatpush3.msk.msra.mxu0 %vm1409_vm4, %v1395_v23 }
 0x6fa   :  { %1348 = vperm.xlu1 %2518, %v1213_v24  }
 0x6fe   :  { %1372 = vperm.xlu1 %2518, %v1217_v25   ;;  %v1223_v25 = vpop.permute.xlu0 %1222 }
 0x702   :  { %1358 = vperm.xlu1 %2518, %v1215_v26  }
 0x706   :  { %1382 = vperm.xlu1 %2518, %v1219_v27   ;;  %v1233_v27 = vpop.permute.xlu0 %1232 }
 0x70a   :  { %1658 = vperm.xlu1 %2518, %v1650_v28  }
 0x70e   :  { %1754 = vperm.xlu1 %2518, %v1746_v29   ;;  %v1238_v29 = vpop.permute.xlu0 %1237 }
 0x712   :  { %1768 = vperm.xlu1 %2518, %v1760_v30  }
 0x716   :  { %1858 = vperm.xlu1 %2518, %v1855_v31   ;;  %v1368_v31 = vpop.permute.xlu0 %1367 }
 0x71a   :  { %1873 = vperm.xlu1 %2518, %v1870_v32  }
 0x748   :  { %v2571_v33 = vpop.permute.xlu1 %2570 }
 0x749   :  { %v2573_v34 = vunpack.i.h.bf16 %v2571_v33  ;;  %v2572_v35 = vunpack.i.l.bf16 %v2571_v33 }
 0x74b   :  { %v2381_v36 = vpack.c.bf16 %v2573_v34, %v2572_v35 }
 0x74d   :  { %2382 = vmatprep.subr.bf16.mxu1 %v2381_v36 }
 0x74e   :  { %2384 = vmatpush3.bf16.msra.mxu1 %v2381_v36 }
 0x751   :  { %2231 = vmatmul.mubr.msk.f32.vlgmr.msra.gmra.mrb[2].mxu1 %vm1054_vm3, %v1011_v37 }
 0x752   :  { %2233 = vmatprep.mubr.msk.f32.mxu1 %vm1054_vm3, %v1012_v38 }
 0x755   :  { %2234 = vmatmul.mubr.msk.f32.gmra.mrb[4].mxu1 %vm1054_vm3, %v1013_v39 }
 0x756   :  { %2244 = vmatprep.mubr.msk.f32.mxu1 %vm1054_vm3, %v1204_v40  ;;  %v1354_v40 = vpop.permute.xlu0 %1353 }
 0x759   :  { %v1042_v44 = vpop.permute.xlu1 %1041 }
 0x75d   :  { %v1052_v46 = vpop.permute.xlu1 %1051 }
 0x761   :  { %v1164_v48 = vpop.permute.xlu1 %1163 }
 0x765   :  { %v1188_v50 = vpop.permute.xlu1 %1187 }
 0x769   :  { %v1174_v57 = vpop.permute.xlu1 %1173 }
 0x76d   :  { %v1198_v7 = vpop.permute.xlu1 %1197 }
 0x771   :  { %v1228_v24 = vpop.permute.xlu1 %1227 }
 0x775   :  { %v1344_v26 = vpop.permute.xlu1 %1343 }
 0x779   :  { %v1349_v28 = vpop.permute.xlu1 %1348 }
 0x77d   :  { %v1373_v30 = vpop.permute.xlu1 %1372 }
 0x781   :  { %v1359_v37 = vpop.permute.xlu1 %1358 }
 0x824   :  { %v2232_v52 = vpop.f32.mrb[2].mxu1 }
 0x825   :  { %v1139_v53 = vadd.f32 %v2232_v52, %v1042_v44  ;;  %v1133_v54 = vpop.f32.mrb[3].mxu1 }
 0x826   :  { %v1134_v55 = vadd.f32 %v1133_v54, %v1037_v45  ;;  %v1378_v54 = vpop.permute.xlu0 %1377 }
 0x827   :  { %v1153_v56 = vmax.f32 %v1139_v53, 0.0 }
 0x828   :  { %v1152_v58 = vmax.f32 %v1134_v55, 0.0  ;;  %v2235_v59 = vpop.f32.mrb[4].mxu1 }
 0x829   :  { %v1177_v61 = vmul.f32 %v1164_v48, %v1153_v56  ;;  %v1149_v62 = vadd.f32 %v2235_v59, %v1052_v46  ;;  %v1143_v63 = vpop.f32.mrb[5].mxu1 }
 0x82a   :  { %v1176_v0 = vmul.f32 %v1159_v49, %v1152_v58  ;;  %v1144_v1 = vadd.f32 %v1143_v63, %v1047_v47 }
 0x82b   :  { %v1201_v2 = vadd.f32 %v1188_v50, %v1177_v61  ;;  %v1155_v3 = vmax.f32 %v1149_v62, 0.0 }
 0x82c   :  { %v1200_v4 = vadd.f32 %v1183_v51, %v1176_v0  ;;  %v1154_v5 = vmax.f32 %v1144_v1, 0.0  ;;  %v1383_v51 = vpop.permute.xlu1 %1382 }
 0x82d   :  { %v1179_v6 = vmul.f32 %v1174_v57, %v1155_v3 }
 0x82e   :  { %v1178_v8 = vmul.f32 %v1169_v60, %v1154_v5  ;;  %v2385_v9 = vpack.c.bf16 %v1201_v2, %v1200_v4  ;;  %v1647_v60 = vld [vmem:[#allocation37] sm:$0xff] }
 0x82f   :  { %v1203_v11 = vadd.f32 %v1198_v7, %v1179_v6 }
 0x830   :  { %v1202_v12 = vadd.f32 %v1193_v10, %v1178_v8  ;;  %2386 = vmatprep.subr.bf16.mxu1 %v2385_v9 }
 0x831   :  { %2388 = vmatpush3.bf16.msra.mxu1 %v2385_v9 }
 0x832   :  { %v2389_v13 = vpack.c.bf16 %v1203_v11, %v1202_v12 }
 0x834   :  { %2390 = vmatprep.subr.bf16.mxu1 %v2389_v13 }
 0x835   :  { %2392 = vmatpush3.bf16.msra.mxu1 %v2389_v13 }
 0x836   :  { %2394 = vmatprep.subr.bf16.mxu1 %v2393_v43 }
 0x838   :  { %2245 = vmatmul.mubr.msk.f32.vlgmr.msra.gmra.mrb[6].mxu1 %vm1054_vm3, %v1205_v14 }
 0x839   :  { %2247 = vmatprep.mubr.msk.f32.mxu1 %vm1054_vm3, %v1206_v15  ;;  %2396 = vmatpush3.bf16.msra.mxu1 %v2393_v43 }
 0x83a   :  { %2398 = vmatprep.subr.bf16.mxu1 %v2397_v19 }
 0x83c   :  { %2248 = vmatmul.mubr.msk.f32.gmra.mrb[8].mxu1 %vm1054_vm3, %v1207_v16  ;;  %vm1954_vm3 = vcmask 15360  }
 0x83d   :  { %2400 = vmatpush3.bf16.msra.mxu1 %v2397_v19 }
 0x83e   :  { %2402 = vmatprep.subr.bf16.mxu1 %v2401_v22 }
 0x841   :  { %2404 = vmatpush3.bf16.msra.mxu1 %v2401_v22 }
 0x842   :  { %2262 = vmatprep.subr.msk.mxu1 %vm1409_vm4, %v1395_v23 }
 0x845   :  { %2263 = vmatpush3.msk.msra.mxu1 %vm1409_vm4, %v1395_v23 }
 0x90b   :  { %v2246_v32 = vpop.f32.mrb[6].mxu1 }
 0x90c   :  { %v1324_v33 = vadd.f32 %v2246_v32, %v1228_v24  ;;  %v1318_v34 = vpop.f32.mrb[7].mxu1 }
 0x90d   :  { %v1319_v35 = vadd.f32 %v1318_v34, %v1223_v25 }
 0x90e   :  { %v1338_v36 = vmax.f32 %v1324_v33, 0.0 }
 0x90f   :  { %v1337_v38 = vmax.f32 %v1319_v35, 0.0  ;;  %v2249_v39 = vpop.f32.mrb[8].mxu1 }
 0x910   :  { %v1362_v41 = vmul.f32 %v1349_v28, %v1338_v36  ;;  %v1334_v42 = vadd.f32 %v2249_v39, %v1238_v29  ;;  %v1328_v43 = vpop.f32.mrb[9].mxu1 }
 0x911   :  { %v1361_v44 = vmul.f32 %v1344_v26, %v1337_v38  ;;  %v1329_v45 = vadd.f32 %v1328_v43, %v1233_v27 }
 0x912   :  { %v1386_v46 = vadd.f32 %v1373_v30, %v1362_v41  ;;  %v1340_v47 = vmax.f32 %v1334_v42, 0.0 }
 0x913   :  { %v1385_v48 = vadd.f32 %v1368_v31, %v1361_v44  ;;  %v1339_v49 = vmax.f32 %v1329_v45, 0.0 }
 0x914   :  { %v1364_v50 = vmul.f32 %v1359_v37, %v1340_v47  ;;  %v1499_v55 = vmul.f32 %v1386_v46, %v1386_v46 }
 0x915   :  { %v1498_v52 = vmul.f32 %v1385_v48, %v1385_v48  ;;  %v1363_v53 = vmul.f32 %v1354_v40, %v1339_v49  ;;  %2264 = vmatprep.mubr.msk.f32.mxu1 %vm1396_vm5, %v1385_v48  ;;  %v1648_v49 = vld [vmem:[#allocation37 + $0x8] sm:$0xff] }
 0x916   :  { %v1388_v56 = vadd.f32 %v1383_v51, %v1364_v50  ;;  %2265 = vmatmul.mubr.msk.f32.vlgmr.msra.gmra.mrb[10].mxu1 %vm1396_vm5, %v1386_v46  ;;  %v3425_v50 = vmov 0.0|0.0   ;;  %v3427_v51 = vmov 0.0  }
 0x917   :  { %v1387_v57 = vadd.f32 %v1378_v54, %v1363_v53  ;;  %2284 = vmatprep.mubr.msk.f32.mxu0 %vm1396_vm5, %v1498_v52  ;;  %2433 = vmatprep.subr.bf16.mxu0 %v3425_v50  ;;  %v1659_v52 = vpop.permute.xlu1 %1658  ;;  %v1654_v53 = vpop.permute.xlu0 %1653 }
 0x918   :  { %2285 = vmatmul.mubr.msk.f32.vlgmr.msra.gmra.mrb[4].mxu0 %vm1396_vm5, %v1499_v55  ;;  %v1501_v59 = vmul.f32 %v1388_v56, %v1388_v56 }
 0x919   :  { %v1500_v58 = vmul.f32 %v1387_v57, %v1387_v57  ;;  %2267 = vmatprep.mubr.msk.f32.mxu1 %vm1396_vm5, %v1387_v57 }
 0x91a   :  { %2268 = vmatmul.mubr.msk.f32.gmra.mrb[12].mxu1 %vm1396_vm5, %v1388_v56 }
 0x91b   :  { %2287 = vmatprep.mubr.msk.f32.mxu0 %vm1396_vm5, %v1500_v58  ;;  %2306 = vmatprep.mubr.msk.f32.mxu1 %vm1661_vm6, %v1647_v60  ;;  %v1755_v54 = vpop.permute.xlu1 %1754  ;;  %v1750_v56 = vpop.permute.xlu0 %1749 }
 0x91c   :  { %2288 = vmatmul.mubr.msk.f32.gmra.mrb[6].mxu0 %vm1396_vm5, %v1501_v59 }
 0x91d   :  { %2313 = vmatprep.mubr.msk.f32.mxu0 %vm3426_vm15, %v3427_v51 }
 0x9e9   :  { %v2266_v61 = vpop.f32.mrb[10].mxu1 }
 0x9ea   :  { %v1600_v62 = vmul.f32 0.11111111, %v2266_v61  ;;  %v1479_v63 = vpop.f32.mrb[11].mxu1 }
 0x9eb   :  { %v1599_v0 = vmul.f32 0.11111111, %v1479_v63  ;;  %v2286_v1 = vpop.f32.mrb[4].mxu0 }
 0x9ec   :  { %v1604_v2 = vmul.f32 %v2266_v61, %v1600_v62  ;;  %v1580_v3 = vpop.f32.mrb[5].mxu0 }
 0x9ed   :  { %v1603_v4 = vmul.f32 %v1599_v0, %v1479_v63  ;;  %v2417_v5 = vpack.c.bf16 %v1600_v62, %v1599_v0  ;;  %v2269_v6 = vpop.f32.mrb[12].mxu1  ;;  %v1769_v63 = vpop.permute.xlu1 %1768 }
 0x9ee   :  { %v1608_v7 = vsub.f32 %v2286_v1, %v1604_v2  ;;  %v1602_v8 = vmul.f32 0.11111111, %v2269_v6  ;;  %v1489_v9 = vpop.f32.mrb[13].mxu1  ;;  %v1764_v1 = vpop.permute.xlu0 %1763 }
 0x9ef   :  { %v1607_v10 = vsub.f32 %v1580_v3, %v1603_v4  ;;  %v1601_v11 = vmul.f32 0.11111111, %v1489_v9  ;;  %v2289_v12 = vpop.f32.mrb[6].mxu0  ;;  %2418 = vmatprep.subr.bf16.mxu1 %v2417_v5 }
 0x9f0   :  { %v1612_v13 = vmul.f32 0.125, %v1608_v7  ;;  %v1606_v14 = vmul.f32 %v2269_v6, %v1602_v8  ;;  %v1590_v15 = vpop.f32.mrb[7].mxu0  ;;  %2420 = vmatpush3.bf16.msra.mxu1 %v2417_v5  ;;  %v1773_v5 = vld [vmem:[#allocation43] sm:$0xf] }
 0x9f1   :  { %v1611_v16 = vmul.f32 0.125, %v1607_v10  ;;  %v1605_v17 = vmul.f32 %v1601_v11, %v1489_v9  ;;  %v2421_v18 = vpack.c.bf16 %v1602_v8, %v1601_v11  ;;  %v1859_v11 = vpop.permute.xlu1 %1858 }
 0x9f2   :  { %v1616_v19 = vmax.f32 %v1612_v13, 0.0  ;;  %v1610_v20 = vsub.f32 %v2289_v12, %v1606_v14  ;;  %v1778_v6 = vpop.permute.xlu0 %1777 }
 0x9f3   :  { %v1615_v21 = vmax.f32 %v1611_v16, 0.0  ;;  %v1609_v22 = vsub.f32 %v1590_v15, %v1605_v17  ;;  %2422 = vmatprep.subr.bf16.mxu1 %v2421_v18  ;;  %v1869_v15 = vld [vmem:[#allocation49] sm:$0xff] }
 0x9f4   :  { %2574 = vrsqrt.f32 %v1616_v19  ;;  %v1614_v23 = vmul.f32 0.125, %v1610_v20  ;;  %2424 = vmatpush3.bf16.msra.mxu1 %v2421_v18  ;;  %vm1628_vm7 = vcmp.eq.f32.partialorder %v1616_v19, inf  ;;  %v1631_v31 = vand.u32 2147483648, %v1616_v19 }
 0x9f5   :  { %2576 = vrsqrt.f32 %v1615_v21  ;;  %v1613_v24 = vmul.f32 0.125, %v1609_v22  ;;  %vm1621_vm8 = vcmp.eq.f32.partialorder %v1615_v21, inf  ;;  %v1624_v32 = vand.u32 2147483648, %v1615_v21  ;;  %v1874_v16 = vpop.permute.xlu1 %1873 }
 0x9f6   :  { %v1618_v25 = vmax.f32 %v1614_v23, 0.0  ;;  %vm1630_vm9 = vcmp.eq.f32.partialorder %v1616_v19, 0.0  ;;  %vm1623_vm10 = vcmp.eq.f32.partialorder %v1615_v21, 0.0  ;;  %v1866_v13 = vpop.permute.xlu0 %1865 }
 0x9f7   :  { %v1617_v26 = vmax.f32 %v1613_v24, 0.0 }
 0x9f8   :  { %2578 = vrsqrt.f32 %v1618_v25  ;;  %vm1642_vm11 = vcmp.eq.f32.partialorder %v1618_v25, inf  ;;  %v1645_v42 = vand.u32 2147483648, %v1618_v25  ;;  %vm1644_vm13 = vcmp.eq.f32.partialorder %v1618_v25, 0.0 }
 0x9f9   :  { %2580 = vrsqrt.f32 %v1617_v26  ;;  %vm1635_vm12 = vcmp.eq.f32.partialorder %v1617_v26, inf  ;;  %v1638_v43 = vand.u32 2147483648, %v1617_v26  ;;  %vm1637_vm14 = vcmp.eq.f32.partialorder %v1617_v26, 0.0 }
 0x9fe   :  { %v2575_v27 = vpop.eup %2574 }
 0x9ff   :  { %v2577_v28 = vpop.eup %2576  ;;  %v1627_v29 = vmul.f32 %v2575_v27, %v1616_v19 }
 0xa00   :  { %v1620_v30 = vmul.f32 %v2577_v28, %v1615_v21 }
 0xa01   :  { %v1629_v33 = vsel %vm1628_vm7, %v1616_v19, %v1627_v29 }
 0xa02   :  { %v2579_v34 = vpop.eup %2578  ;;  %v1622_v35 = vsel %vm1621_vm8, %v1615_v21, %v1620_v30  ;;  %v1632_v36 = vsel %vm1630_vm9, %v1631_v31, %v1629_v33 }
 0xa03   :  { %v2581_v37 = vpop.eup %2580  ;;  %v1625_v38 = vsel %vm1623_vm10, %v1624_v32, %v1622_v35  ;;  %v1641_v39 = vmul.f32 %v2579_v34, %v1618_v25 }
 0xa04   :  { %v2425_v40 = vpack.c.bf16 %v1632_v36, %v1625_v38  ;;  %v1634_v41 = vmul.f32 %v2581_v37, %v1617_v26 }
 0xa05   :  { %v1643_v44 = vsel %vm1642_vm11, %v1618_v25, %v1641_v39 }
 0xa06   :  { %2426 = vmatprep.subr.bf16.mxu1 %v2425_v40  ;;  %v1636_v45 = vsel %vm1635_vm12, %v1617_v26, %v1634_v41  ;;  %v1646_v46 = vsel %vm1644_vm13, %v1645_v42, %v1643_v44 }
 0xa07   :  { %2428 = vmatpush3.bf16.msra.mxu1 %v2425_v40  ;;  %v1639_v47 = vsel %vm1637_vm14, %v1638_v43, %v1636_v45 }
 0xa08   :  { %v2429_v48 = vpack.c.bf16 %v1646_v46, %v1639_v47 }
 0xa0a   :  { %2430 = vmatprep.subr.bf16.mxu1 %v2429_v48 }
 0xa0b   :  { %2432 = vmatpush3.bf16.msra.mxu1 %v2429_v48 }
 0xa0e   :  { %2307 = vmatmul.mubr.msk.f32.vlgmr.msra.gmra.mrb[14].mxu1 %vm1661_vm6, %v1648_v49 }
 0xae1   :  { %v2308_v55 = vpop.f32.mrb[14].mxu1 }
 0xae2   :  { %v1740_v57 = vadd.f32 %v2308_v55, %v1659_v52  ;;  %v1734_v58 = vpop.f32.mrb[15].mxu1 }
 0xae3   :  { %v1735_v59 = vadd.f32 %v1734_v58, %v1654_v53 }
 0xae4   :  { %v1744_v60 = vmax.f32 %v1740_v57, 0.0 }
 0xae5   :  { %v1743_v61 = vmax.f32 %v1735_v59, 0.0 }
 0xae6   :  { %v1758_v62 = vmul.f32 %v1755_v54, %v1744_v60 }
 0xae7   :  { %v1757_v0 = vmul.f32 %v1750_v56, %v1743_v61 }
 0xae8   :  { %v1772_v2 = vadd.f32 %v1769_v63, %v1758_v62 }
 0xae9   :  { %v1771_v3 = vadd.f32 %v1764_v1, %v1757_v0 }
 0xaeb   :  { %v2434_v4 = vpack.c.bf16 %v1772_v2, %v1771_v3 }
 0xaed   :  { %2435 = vmatpush3.bf16.msra.mxu0 %v2434_v4 }
 0xaee   :  { %2316 = vmatprep.subr.mxu0 %v3427_v51 }
 0xaf0   :  { %2314 = vmatmul.mubr.msk.f32.vlgmr.msra.gmra.mrb[8].mxu0 %vm1780_vm0, %v1773_v5 }
 0xaf1   :  { %2318 = vmatprep.mubr.msk.f32.mxu0 %vm3426_vm15, %v3427_v51 }
 0xbc3   :  { %v1850_v7 = vpop.f32.mrb[8].mxu0 }
 0xbc4   :  { %v1851_v8 = vadd.f32 %v1850_v7, %v1778_v6  ;;  %v2315_v9 = vpop.f32.mrb[9].mxu0 }
 0xbc6   :  { %v1854_v10 = vmax.f32 %v1851_v8, 0.0 }
 0xbc8   :  { %v1861_v12 = vmul.f32 %v1859_v11, %v1854_v10 }
 0xbca   :  { %v1868_v14 = vadd.f32 %v1866_v13, %v1861_v12 }
 0xbcc   :  { %2317 = vmatpush3.msk.msra.mxu0 %vm1880_vm1, %v1868_v14 }
 0xbcd   :  { %2319 = vmatmul.mubr.msk.f32.vlgmr.msra.gmra.mrb[10].mxu0 %vm1876_vm2, %v1869_v15 }
 0xca0   :  { %v1950_v17 = vpop.f32.mrb[10].mxu0 }
 0xca1   :  { %v1951_v18 = vadd.f32 %v1950_v17, %v1874_v16  ;;  %v2320_v19 = vpop.f32.mrb[11].mxu0 }
 0xca3   :  { %v1955_v20 = vsel %vm1954_vm3, %v1951_v18, -inf }
 0xca4   :  { %v1956_v21 = vrot.slane %v1955_v20, 4 }
 0xca6   :  { %v1957_v22 = vmax.f32 %v1955_v20, %v1956_v21 }
 0xca8   :  { %v1958_v23 = vrot.slane %v1957_v22, 2 }
 0xcaa   :  { %v1959_v24 = vmax.f32 %v1957_v22, %v1958_v23 }
 0xcac   :  { %v1960_v25 = vrot.slane %v1959_v24, 1 }
 0xcae   :  { %v1961_v26 = vmax.f32 %v1959_v24, %v1960_v25 }
 0xcb0   :  { %v1962_v27 = vsub.f32 %v1951_v18, %v1961_v26 }
 0xcb2   :  { %v1963_v28 = vmul.f32 1.442695, %v1962_v27 }
 0xcb4   :  { %2582 = vpow2.f32 %v1963_v28 }
 0xcbe   :  { %v2583_v29 = vpop.eup %2582 }
 0xcbf   :  { %v1965_v30 = vsel %vm1954_vm3, %v2583_v29, 0.0 }
 0xcc0   :  { %v1966_v31 = vrot.slane %v1965_v30, 4 }
 0xcc2   :  { %v1967_v32 = vadd.f32 %v1966_v31, %v1965_v30 }
 0xcc4   :  { %v1968_v33 = vrot.slane %v1967_v32, 2 }
 0xcc6   :  { %v1969_v34 = vadd.f32 %v1968_v33, %v1967_v32 }
 0xcc8   :  { %v1970_v35 = vrot.slane %v1969_v34, 1 }
 0xcca   :  { %v1971_v36 = vadd.f32 %v1970_v35, %v1969_v34 }
 0xccc   :  { %2584 = vrcp.f32 %v1971_v36 }
 0xcd6   :  { %v2585_v37 = vpop.eup %2584 }
 0xcd7   :  { %v1973_v38 = vmul.f32 %v2585_v37, %v2583_v29 }
 0xcd9   :  { %1974 = vst.msk [vmem:[#allocation52] sm:$0xff] %vm1954_vm3, %v1973_v38 }
 0xcda   :  { %3301 = shalt.err (!%p3298_p8)
}
 0xcdb   :  { %s3302_s26 = scalar_lea.hbm %s3597_s27, 128 }
 0xcdc   :  { %p3303_p9 = scmp.ne.s32.totalorder %s3597_s27, %s3302_s26  ;;  %p3306_p10 = scmp.lt.u32.totalorder %s3302_s26, %s3597_s27 }
 0xcde   :  { %p3308_p11 = pnand %p3306_p10, %p3303_p9 }
 0xce0   :  { %3311 = shalt.err (!%p3308_p11)
}
 0xce1   :  { %1984 = dma.vmem_to_hbm [thread:$0]  %s1982_s9, 128, %s3597_s27, [#allocation4]  }
 0xce2   :  { %3346 = dma.done.wait [#allocation4], 128  }
 0xce3   :  { %3347 = vsyncadd [#allocation4], 4294967168 }
 0xce4   :  { %1988 = vsyncpa [#allocation3], 1 }
 0xce5   :  { %1989 = vsyncpa [#allocation6], 1 }
 0xce6   :  { %1990 = vsyncpa [#allocation9], 1 }
 0xce7   :  { %1991 = vsyncpa [#allocation12], 1 }
 0xce8   :  { %1992 = vsyncpa [#allocation15], 1 }
 0xce9   :  { %1993 = vsyncpa [#allocation18], 1 }
 0xcea   :  { %1994 = vsyncpa [#allocation21], 1 }
 0xceb   :  { %1995 = vsyncpa [#allocation24], 1 }
 0xcec   :  { %1996 = vsyncpa [#allocation27], 1 }
 0xced   :  { %1997 = vsyncpa [#allocation30], 1 }
 0xcee   :  { %1998 = vsyncpa [#allocation33], 1 }
 0xcef   :  { %1999 = vsyncpa [#allocation36], 1 }
 0xcf0   :  { %2000 = vsyncpa [#allocation39], 1 }
 0xcf1   :  { %2001 = vsyncpa [#allocation42], 1 }
 0xcf2   :  { %2002 = vsyncpa [#allocation45], 1 }
 0xcf3   :  { %2003 = vsyncpa [#allocation48], 1 }
 0xcf4   :  { %2004 = vsyncpa [#allocation51], 1 }
 0xcf5   :  { %2005 = vsyncpa [#allocation4], 1 }

</bundles_post_ra>
